<compile_context>
chip_gen: v6e
topology: v6e:2x2x1
jax: 0.10.0
libtpu: 0.0.40
codegen_flags: <defaults>
</compile_context>

<pallas_src>
import functools
import math

import jax
import jax.numpy as jnp
from jax.experimental import pallas as pl
from jax.experimental.pallas import tpu as pltpu


# ---------------------------------------------------------------- helpers ---
def _layernorm(x, gamma, beta, eps=1e-5):
    mu = jnp.mean(x, axis=-1, keepdims=True)
    var = jnp.mean((x - mu) ** 2, axis=-1, keepdims=True)
    return (x - mu) * jax.lax.rsqrt(var + eps) * gamma + beta


def _gelu_exact(x):
    # torch.nn.functional.gelu default (erf-based, not tanh approximation)
    return 0.5 * x * (1.0 + jax.lax.erf(x * jnp.float32(1.0 / math.sqrt(2.0))))


# q @ k^T expressed as dot_general contracting the last dims (no k transpose)
_NT_DIMS = (((1,), (1,)), ((), ()))


# ----------------------------------------------------------- fused kernel ---
def encoder_layer_kernel(x_ref, wqkv_ref, bqkv_ref, wout_ref, bout_ref,
                         ln1g_ref, ln1b_ref, ln2g_ref, ln2b_ref,
                         w1_ref, b1_ref, w2_ref, b2_ref,
                         o_ref, h1_scr, acc_scr, *, compute_dtype):
    """Grid = (batch, heads).  One attention head per step; MLP fused at the end."""
    h = pl.program_id(1)
    f32 = jnp.float32

    # ---- once per batch element: LayerNorm1 + accumulator init -------------
    @pl.when(h == 0)
    def _():
        x = x_ref[0].astype(f32)                                     # (S, D)
        h1_scr[...] = _layernorm(x, ln1g_ref[0], ln1b_ref[0]).astype(compute_dtype)
        acc_scr[...] = jnp.zeros_like(acc_scr)

    # ---- one attention head per grid step -----------------------------------
    h1 = h1_scr[...]                                                 # (S, D)
    # scale 1/sqrt(hd) is already folded into the Q weights/bias (wrapper-side)
    q = jnp.dot(h1, wqkv_ref[0, 0], preferred_element_type=f32) + bqkv_ref[0, 0]
    k = jnp.dot(h1, wqkv_ref[1, 0], preferred_element_type=f32) + bqkv_ref[1, 0]
    v = jnp.dot(h1, wqkv_ref[2, 0], preferred_element_type=f32) + bqkv_ref[2, 0]

    logits = jax.lax.dot_general(q.astype(compute_dtype), k.astype(compute_dtype),
                                 _NT_DIMS, preferred_element_type=f32)   # (S, S)
    logits = logits - jnp.max(logits, axis=-1, keepdims=True)
    p = jnp.exp(logits)
    p = p * pl.reciprocal(jnp.sum(p, axis=-1, keepdims=True), approx=True)

    vals = jnp.dot(p.astype(compute_dtype), v.astype(compute_dtype),
                   preferred_element_type=f32)                        # (S, hd)
    acc_scr[...] += jnp.dot(vals.astype(compute_dtype), wout_ref[0],
                            preferred_element_type=f32)               # (S, D)

    # ---- once per batch element: attention residual + fused MLP block -------
    @pl.when(h == pl.num_programs(1) - 1)
    def _():
        x = x_ref[0].astype(f32)
        y = x + acc_scr[...] + bout_ref[0]                            # attn residual
        h2 = _layernorm(y, ln2g_ref[0], ln2b_ref[0]).astype(compute_dtype)
        m = jnp.dot(h2, w1_ref[...], preferred_element_type=f32) + b1_ref[0]
        m = _gelu_exact(m).astype(compute_dtype)
        out = y + jnp.dot(m, w2_ref[...], preferred_element_type=f32) + b2_ref[0]
        o_ref[0] = out.astype(o_ref.dtype)


# --------------------------------------------------------------- wrappers ---
def encoder_layer(x, attn_p, mlp_p, heads, compute_dtype):
    B, S, D = x.shape
    assert D % heads == 0, "hidden_size must be divisible by num_attention_heads"
    hd = D // heads
    F = mlp_p["w1"].shape[1]
    f32 = jnp.float32

    # Layout plumbing (wrapper-side, free): torch-interleaved qkv columns
    # [head0: q|k|v, head1: q|k|v, ...] -> head-blocked (3, H, D, hd), with the
    # softmax 1/sqrt(hd) scale folded into the Q projection weights/bias.
    comp_scale = jnp.array([1.0 / math.sqrt(hd), 1.0, 1.0], f32)
    wqkv = attn_p["wqkv"].reshape(D, heads, 3, hd).transpose(2, 1, 0, 3)   # (3,H,D,hd)
    wqkv = (wqkv * comp_scale.reshape(3, 1, 1, 1)).astype(compute_dtype)
    bqkv = attn_p["bqkv"].reshape(heads, 3, hd).transpose(1, 0, 2)         # (3,H,hd)
    bqkv = (bqkv * comp_scale.reshape(3, 1, 1)).reshape(3, heads, 1, hd)   # f32
    wout = attn_p["wout"].reshape(heads, hd, D).astype(compute_dtype)      # (H,hd,D)
    w1 = mlp_p["w1"].astype(compute_dtype)
    w2 = mlp_p["w2"].astype(compute_dtype)

    kernel = functools.partial(encoder_layer_kernel, compute_dtype=compute_dtype)
    return pl.pallas_call(
        kernel,
        out_shape=jax.ShapeDtypeStruct((B, S, D), x.dtype),
        grid=(B, heads),
        in_specs=[
            pl.BlockSpec((1, S, D), lambda b, h: (b, 0, 0)),          # x (DMA'd once / batch)
            pl.BlockSpec((3, 1, D, hd), lambda b, h: (0, h, 0, 0)),   # per-head q|k|v weights
            pl.BlockSpec((3, 1, 1, hd), lambda b, h: (0, h, 0, 0)),   # per-head q|k|v biases
            pl.BlockSpec((1, hd, D), lambda b, h: (h, 0, 0)),         # per-head out-proj rows
            pl.BlockSpec((1, D), lambda b, h: (0, 0)),                # bout
            pl.BlockSpec((1, D), lambda b, h: (0, 0)),                # ln1 gamma
            pl.BlockSpec((1, D), lambda b, h: (0, 0)),                # ln1 beta
            pl.BlockSpec((1, D), lambda b, h: (0, 0)),                # ln2 gamma
            pl.BlockSpec((1, D), lambda b, h: (0, 0)),                # ln2 beta
            pl.BlockSpec((D, F), lambda b, h: (0, 0)),                # w1 (resident)
            pl.BlockSpec((1, F), lambda b, h: (0, 0)),                # b1
            pl.BlockSpec((F, D), lambda b, h: (0, 0)),                # w2 (resident)
            pl.BlockSpec((1, D), lambda b, h: (0, 0)),                # b2
        ],
        out_specs=pl.BlockSpec((1, S, D), lambda b, h: (b, 0, 0)),
        scratch_shapes=[pltpu.VMEM((S, D), compute_dtype),            # LayerNorm1(x)
                        pltpu.VMEM((S, D), jnp.float32)],             # attn out-proj accumulator
        compiler_params=pltpu.CompilerParams(
            dimension_semantics=("parallel", "arbitrary"),
            vmem_limit_bytes=48 * 1024 * 1024),
    )(x, wqkv, bqkv, wout, attn_p["bout"],
      attn_p["ln_g"], attn_p["ln_b"], mlp_p["ln_g"], mlp_p["ln_b"],
      w1, mlp_p["b1"], w2, mlp_p["b2"])


@functools.partial(jax.jit, static_argnames=("heads", "compute_dtype"))
def transformer_encoder(x, params, heads, compute_dtype=jnp.float32):
    for attn_p, mlp_p in params:
        x = encoder_layer(x, attn_p, mlp_p, heads, compute_dtype)
    return x


# ----------------------------------------------------- parameter creation ---
def init_params(key, num_layers, dim, inter):
    params = []
    for _ in range(num_layers):
        key, *ks = jax.random.split(key, 9)
        attn = dict(
            ln_g=jnp.ones((1, dim), jnp.float32),
            ln_b=jnp.zeros((1, dim), jnp.float32),
            # torch layout: view(B,S,H,3*hd) -> columns interleaved per head [q|k|v]
            wqkv=0.02 * jax.random.normal(ks[0], (dim, 3 * dim), jnp.float32),
            bqkv=0.02 * jax.random.normal(ks[1], (1, 3 * dim), jnp.float32),
            wout=0.02 * jax.random.normal(ks[2], (dim, dim), jnp.float32),
            bout=0.02 * jax.random.normal(ks[3], (1, dim), jnp.float32),
        )
        mlp = dict(
            ln_g=jnp.ones((1, dim), jnp.float32),
            ln_b=jnp.zeros((1, dim), jnp.float32),
            w1=0.02 * jax.random.normal(ks[4], (dim, inter), jnp.float32),
            b1=0.02 * jax.random.normal(ks[5], (1, inter), jnp.float32),
            w2=0.02 * jax.random.normal(ks[6], (inter, dim), jnp.float32),
            b2=0.02 * jax.random.normal(ks[7], (1, dim), jnp.float32),
        )
        params.append((attn, mlp))
    return params


# ---------------------------------------------------- pure-JAX reference ----
def _ref_attention(x, p, heads):
    B, S, D = x.shape
    hd = D // heads
    h = _layernorm(x, p["ln_g"][0], p["ln_b"][0])
    qkv = h @ p["wqkv"] + p["bqkv"][0]                       # (B, S, 3D)
    qkv = qkv.reshape(B, S, heads, 3 * hd).transpose(0, 2, 1, 3)
    q, k, v = jnp.split(qkv, 3, axis=-1)
    logits = jnp.einsum("bhqd,bhkd->bhqk", q, k) / math.sqrt(hd)
    attn = jax.nn.softmax(logits, axis=-1)
    vals = jnp.einsum("bhqk,bhkd->bhqd", attn, v)
    vals = vals.transpose(0, 2, 1, 3).reshape(B, S, D)
    return x + (vals @ p["wout"] + p["bout"][0])


def _ref_mlp(x, p):
    h = _layernorm(x, p["ln_g"][0], p["ln_b"][0])
    h = _gelu_exact(h @ p["w1"] + p["b1"][0])
    return x + (h @ p["w2"] + p["b2"][0])


def transformer_encoder_ref(x, params, heads):
    for attn_p, mlp_p in params:
        x = _ref_attention(x, attn_p, heads)
        x = _ref_mlp(x, mlp_p)
    return x


# --------------------------------------------------------------------- main -
if __name__ == "__main__":
    def run_case(label, batch, seq, hidden, heads, inter, layers, compute_dtype, tol):
        key = jax.random.PRNGKey(0)
        kx, kp = jax.random.split(key)
        x = jax.random.normal(kx, (batch, seq, hidden), jnp.float32)
        params = init_params(kp, layers, hidden, inter)
        out = jax.block_until_ready(
            transformer_encoder(x, params, heads=heads, compute_dtype=compute_dtype))
        ref = transformer_encoder_ref(x, params, heads)
        assert out.shape == (batch, seq, hidden)
        err = float(jnp.max(jnp.abs(out - ref)))
        assert jnp.allclose(out, ref, atol=tol, rtol=tol), f"{label}: max abs err {err}"

    # tiny, unaligned shapes (exercise padded / masked paths)
    run_case("tiny-f32", batch=2, seq=8, hidden=32, heads=4, inter=64,
             layers=2, compute_dtype=jnp.float32, tol=1e-3)
    # (8,128)-aligned shapes: lane-dense stores, hd=32
    run_case("aligned-f32", batch=2, seq=128, hidden=128, heads=4, inter=256,
             layers=2, compute_dtype=jnp.float32, tol=1e-3)
    # bf16 MXU inputs with f32 LayerNorm/softmax/accumulation (v6e/v7x fast path)
    run_case("aligned-bf16", batch=2, seq=128, hidden=128, heads=4, inter=256,
             layers=2, compute_dtype=jnp.bfloat16, tol=3e-2)

    print("KERNEL_OK")
</pallas_src>

<mosaic_0001>
module attributes {stable_mosaic.version = 11 : i64} {
  func.func @encoder_layer_kernel(%arg0: i32, %arg1: i32, %arg2: memref<1x8x32xf32, #tpu.memory_space<vmem>>, %arg3: memref<3x1x32x8xf32, #tpu.memory_space<vmem>>, %arg4: memref<3x1x1x8xf32, #tpu.memory_space<vmem>>, %arg5: memref<1x8x32xf32, #tpu.memory_space<vmem>>, %arg6: memref<1x32xf32, #tpu.memory_space<vmem>>, %arg7: memref<1x32xf32, #tpu.memory_space<vmem>>, %arg8: memref<1x32xf32, #tpu.memory_space<vmem>>, %arg9: memref<1x32xf32, #tpu.memory_space<vmem>>, %arg10: memref<1x32xf32, #tpu.memory_space<vmem>>, %arg11: memref<32x64xf32, #tpu.memory_space<vmem>>, %arg12: memref<1x64xf32, #tpu.memory_space<vmem>>, %arg13: memref<64x32xf32, #tpu.memory_space<vmem>>, %arg14: memref<1x32xf32, #tpu.memory_space<vmem>>, %arg15: memref<1x8x32xf32, #tpu.memory_space<vmem>>, %arg16: memref<8x32xf32, #tpu.memory_space<vmem>>, %arg17: memref<8x32xf32, #tpu.memory_space<vmem>>) attributes {dimension_semantics = [#tpu.dimension_semantics<parallel>, #tpu.dimension_semantics<arbitrary>], iteration_bounds = array<i64: 2, 4>, scalar_prefetch = 0 : i64, scratch_operands = 2 : i64, tpu.core_type = #tpu.core_type<tc>, window_params = [{transform_indices = @transform_0, window_bounds = array<i64: 1, 8, 32>}, {transform_indices = @transform_1, window_bounds = array<i64: 3, 1, 32, 8>}, {transform_indices = @transform_2, window_bounds = array<i64: 3, 1, 1, 8>}, {transform_indices = @transform_3, window_bounds = array<i64: 1, 8, 32>}, {pipeline_mode = #tpu.pipeline_mode<synchronous>, transform_indices = @transform_4, window_bounds = array<i64: 1, 32>}, {pipeline_mode = #tpu.pipeline_mode<synchronous>, transform_indices = @transform_5, window_bounds = array<i64: 1, 32>}, {pipeline_mode = #tpu.pipeline_mode<synchronous>, transform_indices = @transform_6, window_bounds = array<i64: 1, 32>}, {pipeline_mode = #tpu.pipeline_mode<synchronous>, transform_indices = @transform_7, window_bounds = array<i64: 1, 32>}, {pipeline_mode = #tpu.pipeline_mode<synchronous>, transform_indices = @transform_8, window_bounds = array<i64: 1, 32>}, {pipeline_mode = #tpu.pipeline_mode<synchronous>, transform_indices = @transform_9, window_bounds = array<i64: 32, 64>}, {pipeline_mode = #tpu.pipeline_mode<synchronous>, transform_indices = @transform_10, window_bounds = array<i64: 1, 64>}, {pipeline_mode = #tpu.pipeline_mode<synchronous>, transform_indices = @transform_11, window_bounds = array<i64: 64, 32>}, {pipeline_mode = #tpu.pipeline_mode<synchronous>, transform_indices = @transform_12, window_bounds = array<i64: 1, 32>}, {transform_indices = @transform_13, window_bounds = array<i64: 1, 8, 32>}]} {
    %c0_i32 = arith.constant 0 : i32
    %0 = arith.cmpi eq, %arg1, %c0_i32 : i32
    %1 = arith.extui %0 : i1 to i32
    %c0_i32_0 = arith.constant 0 : i32
    %2 = arith.cmpi ne, %1, %c0_i32_0 : i32
    scf.if %2 {
      %c0_39 = arith.constant 0 : index
      %c0_40 = arith.constant 0 : index
      %c0_41 = arith.constant 0 : index
      %46 = vector.load %arg2[%c0_39, %c0_40, %c0_41] : memref<1x8x32xf32, #tpu.memory_space<vmem>>, vector<1x8x32xf32>
      %47 = vector.shape_cast %46 : vector<1x8x32xf32> to vector<8x32xf32>
      %c0_42 = arith.constant 0 : index
      %c0_43 = arith.constant 0 : index
      %48 = vector.load %arg7[%c0_42, %c0_43] : memref<1x32xf32, #tpu.memory_space<vmem>>, vector<1x32xf32>
      %49 = vector.shape_cast %48 : vector<1x32xf32> to vector<32xf32>
      %c0_44 = arith.constant 0 : index
      %c0_45 = arith.constant 0 : index
      %50 = vector.load %arg8[%c0_44, %c0_45] : memref<1x32xf32, #tpu.memory_space<vmem>>, vector<1x32xf32>
      %51 = vector.shape_cast %50 : vector<1x32xf32> to vector<32xf32>
      %cst_46 = arith.constant dense<0.000000e+00> : vector<8xf32>
      %52 = vector.multi_reduction <add>, %47, %cst_46 [1] : vector<8x32xf32> to vector<8xf32>
      %53 = vector.shape_cast %52 : vector<8xf32> to vector<8x1xf32>
      %cst_47 = arith.constant 3.200000e+01 : f32
      %54 = vector.broadcast %cst_47 : f32 to vector<8x1xf32>
      %55 = arith.divf %53, %54 : vector<8x1xf32>
      %56 = vector.broadcast %55 : vector<8x1xf32> to vector<8x32xf32>
      %57 = arith.subf %47, %56 : vector<8x32xf32>
      %58 = arith.mulf %57, %57 : vector<8x32xf32>
      %cst_48 = arith.constant dense<0.000000e+00> : vector<8xf32>
      %59 = vector.multi_reduction <add>, %58, %cst_48 [1] : vector<8x32xf32> to vector<8xf32>
      %60 = vector.shape_cast %59 : vector<8xf32> to vector<8x1xf32>
      %cst_49 = arith.constant 3.200000e+01 : f32
      %61 = vector.broadcast %cst_49 : f32 to vector<8x1xf32>
      %62 = arith.divf %60, %61 : vector<8x1xf32>
      %63 = vector.broadcast %55 : vector<8x1xf32> to vector<8x32xf32>
      %64 = arith.subf %47, %63 : vector<8x32xf32>
      %cst_50 = arith.constant 9.99999974E-6 : f32
      %65 = vector.broadcast %cst_50 : f32 to vector<8x1xf32>
      %66 = arith.addf %62, %65 : vector<8x1xf32>
      %67 = math.rsqrt %66 : vector<8x1xf32>
      %68 = vector.broadcast %67 : vector<8x1xf32> to vector<8x32xf32>
      %69 = arith.mulf %64, %68 : vector<8x32xf32>
      %70 = vector.shape_cast %49 : vector<32xf32> to vector<1x32xf32>
      %71 = vector.broadcast %70 : vector<1x32xf32> to vector<8x32xf32>
      %72 = arith.mulf %69, %71 : vector<8x32xf32>
      %73 = vector.shape_cast %51 : vector<32xf32> to vector<1x32xf32>
      %74 = vector.broadcast %73 : vector<1x32xf32> to vector<8x32xf32>
      %75 = arith.addf %72, %74 : vector<8x32xf32>
      %c0_51 = arith.constant 0 : index
      %c0_52 = arith.constant 0 : index
      %76 = vector.load %arg16[%c0_51, %c0_52] : memref<8x32xf32, #tpu.memory_space<vmem>>, vector<8x32xf32>
      tpu.vector_store %arg16[%c0_51, %c0_52], %75 {strides = array<i32>} : memref<8x32xf32, #tpu.memory_space<vmem>>, vector<8x32xf32>,
      %cst_53 = arith.constant 0.000000e+00 : f32
      %77 = vector.broadcast %cst_53 : f32 to vector<8x32xf32>
      %c0_54 = arith.constant 0 : index
      %c0_55 = arith.constant 0 : index
      %78 = vector.load %arg17[%c0_54, %c0_55] : memref<8x32xf32, #tpu.memory_space<vmem>>, vector<8x32xf32>
      tpu.vector_store %arg17[%c0_54, %c0_55], %77 {strides = array<i32>} : memref<8x32xf32, #tpu.memory_space<vmem>>, vector<8x32xf32>,
    } else {
    }
    %c0 = arith.constant 0 : index
    %c0_1 = arith.constant 0 : index
    %3 = vector.load %arg16[%c0, %c0_1] : memref<8x32xf32, #tpu.memory_space<vmem>>, vector<8x32xf32>
    %c0_2 = arith.constant 0 : index
    %c0_3 = arith.constant 0 : index
    %c0_4 = arith.constant 0 : index
    %c0_5 = arith.constant 0 : index
    %4 = vector.load %arg3[%c0_2, %c0_3, %c0_4, %c0_5] : memref<3x1x32x8xf32, #tpu.memory_space<vmem>>, vector<1x1x32x8xf32>
    %5 = vector.shape_cast %4 : vector<1x1x32x8xf32> to vector<32x8xf32>
    %cst = arith.constant dense<0.000000e+00> : vector<8x8xf32>
    %6 = tpu.matmul %3, %5, %cst {dimension_numbers = #tpu.dot_dimension_numbers<[1], [0], [0], [1], [0, 0, 1, 1], [], []>} : vector<8x32xf32>, vector<32x8xf32>, vector<8x8xf32> -> vector<8x8xf32>
    %c0_6 = arith.constant 0 : index
    %c0_7 = arith.constant 0 : index
    %c0_8 = arith.constant 0 : index
    %c0_9 = arith.constant 0 : index
    %7 = vector.load %arg4[%c0_6, %c0_7, %c0_8, %c0_9] : memref<3x1x1x8xf32, #tpu.memory_space<vmem>>, vector<1x1x1x8xf32>
    %8 = vector.shape_cast %7 : vector<1x1x1x8xf32> to vector<1x8xf32>
    %9 = vector.broadcast %8 : vector<1x8xf32> to vector<8x8xf32>
    %10 = arith.addf %6, %9 : vector<8x8xf32>
    %c1 = arith.constant 1 : index
    %c0_10 = arith.constant 0 : index
    %c0_11 = arith.constant 0 : index
    %c0_12 = arith.constant 0 : index
    %11 = vector.load %arg3[%c1, %c0_10, %c0_11, %c0_12] : memref<3x1x32x8xf32, #tpu.memory_space<vmem>>, vector<1x1x32x8xf32>
    %12 = vector.shape_cast %11 : vector<1x1x32x8xf32> to vector<32x8xf32>
    %cst_13 = arith.constant dense<0.000000e+00> : vector<8x8xf32>
    %13 = tpu.matmul %3, %12, %cst_13 {dimension_numbers = #tpu.dot_dimension_numbers<[1], [0], [0], [1], [0, 0, 1, 1], [], []>} : vector<8x32xf32>, vector<32x8xf32>, vector<8x8xf32> -> vector<8x8xf32>
    %c1_14 = arith.constant 1 : index
    %c0_15 = arith.constant 0 : index
    %c0_16 = arith.constant 0 : index
    %c0_17 = arith.constant 0 : index
    %14 = vector.load %arg4[%c1_14, %c0_15, %c0_16, %c0_17] : memref<3x1x1x8xf32, #tpu.memory_space<vmem>>, vector<1x1x1x8xf32>
    %15 = vector.shape_cast %14 : vector<1x1x1x8xf32> to vector<1x8xf32>
    %16 = vector.broadcast %15 : vector<1x8xf32> to vector<8x8xf32>
    %17 = arith.addf %13, %16 : vector<8x8xf32>
    %c2 = arith.constant 2 : index
    %c0_18 = arith.constant 0 : index
    %c0_19 = arith.constant 0 : index
    %c0_20 = arith.constant 0 : index
    %18 = vector.load %arg3[%c2, %c0_18, %c0_19, %c0_20] : memref<3x1x32x8xf32, #tpu.memory_space<vmem>>, vector<1x1x32x8xf32>
    %19 = vector.shape_cast %18 : vector<1x1x32x8xf32> to vector<32x8xf32>
    %cst_21 = arith.constant dense<0.000000e+00> : vector<8x8xf32>
    %20 = tpu.matmul %3, %19, %cst_21 {dimension_numbers = #tpu.dot_dimension_numbers<[1], [0], [0], [1], [0, 0, 1, 1], [], []>} : vector<8x32xf32>, vector<32x8xf32>, vector<8x8xf32> -> vector<8x8xf32>
    %c2_22 = arith.constant 2 : index
    %c0_23 = arith.constant 0 : index
    %c0_24 = arith.constant 0 : index
    %c0_25 = arith.constant 0 : index
    %21 = vector.load %arg4[%c2_22, %c0_23, %c0_24, %c0_25] : memref<3x1x1x8xf32, #tpu.memory_space<vmem>>, vector<1x1x1x8xf32>
    %22 = vector.shape_cast %21 : vector<1x1x1x8xf32> to vector<1x8xf32>
    %23 = vector.broadcast %22 : vector<1x8xf32> to vector<8x8xf32>
    %24 = arith.addf %20, %23 : vector<8x8xf32>
    %cst_26 = arith.constant dense<0.000000e+00> : vector<8x8xf32>
    %25 = tpu.matmul %10, %17, %cst_26 {dimension_numbers = #tpu.dot_dimension_numbers<[1], [1], [0], [0], [0, 0, 1, 0], [], []>} : vector<8x8xf32>, vector<8x8xf32>, vector<8x8xf32> -> vector<8x8xf32>
    %cst_27 = arith.constant dense<0xFF800000> : vector<8xf32>
    %26 = vector.multi_reduction <maximumf>, %25, %cst_27 [1] : vector<8x8xf32> to vector<8xf32>
    %27 = vector.shape_cast %26 : vector<8xf32> to vector<8x1xf32>
    %28 = vector.broadcast %27 : vector<8x1xf32> to vector<8x8xf32>
    %29 = arith.subf %25, %28 : vector<8x8xf32>
    %30 = math.exp %29 : vector<8x8xf32>
    %cst_28 = arith.constant dense<0.000000e+00> : vector<8xf32>
    %31 = vector.multi_reduction <add>, %30, %cst_28 [1] : vector<8x8xf32> to vector<8xf32>
    %32 = vector.shape_cast %31 : vector<8xf32> to vector<8x1xf32>
    %33 = tpu.reciprocal %32 {approx = true} : vector<8x1xf32> -> vector<8x1xf32>
    %34 = vector.broadcast %33 : vector<8x1xf32> to vector<8x8xf32>
    %35 = arith.mulf %30, %34 : vector<8x8xf32>
    %cst_29 = arith.constant dense<0.000000e+00> : vector<8x8xf32>
    %36 = tpu.matmul %35, %24, %cst_29 {dimension_numbers = #tpu.dot_dimension_numbers<[1], [0], [0], [1], [0, 0, 1, 1], [], []>} : vector<8x8xf32>, vector<8x8xf32>, vector<8x8xf32> -> vector<8x8xf32>
    %c0_30 = arith.constant 0 : index
    %c0_31 = arith.constant 0 : index
    %37 = vector.load %arg17[%c0_30, %c0_31] : memref<8x32xf32, #tpu.memory_space<vmem>>, vector<8x32xf32>
    %c0_32 = arith.constant 0 : index
    %c0_33 = arith.constant 0 : index
    %c0_34 = arith.constant 0 : index
    %38 = vector.load %arg5[%c0_32, %c0_33, %c0_34] : memref<1x8x32xf32, #tpu.memory_space<vmem>>, vector<1x8x32xf32>
    %39 = vector.shape_cast %38 : vector<1x8x32xf32> to vector<8x32xf32>
    %cst_35 = arith.constant dense<0.000000e+00> : vector<8x32xf32>
    %40 = tpu.matmul %36, %39, %cst_35 {dimension_numbers = #tpu.dot_dimension_numbers<[1], [0], [0], [1], [0, 0, 1, 1], [], []>} : vector<8x8xf32>, vector<8x32xf32>, vector<8x32xf32> -> vector<8x32xf32>
    %41 = arith.addf %37, %40 : vector<8x32xf32>
    %c0_36 = arith.constant 0 : index
    %c0_37 = arith.constant 0 : index
    %42 = vector.load %arg17[%c0_36, %c0_37] : memref<8x32xf32, #tpu.memory_space<vmem>>, vector<8x32xf32>
    tpu.vector_store %arg17[%c0_36, %c0_37], %41 {strides = array<i32>} : memref<8x32xf32, #tpu.memory_space<vmem>>, vector<8x32xf32>,
    %c3_i32 = arith.constant 3 : i32
    %43 = arith.cmpi eq, %arg1, %c3_i32 : i32
    %44 = arith.extui %43 : i1 to i32
    %c0_i32_38 = arith.constant 0 : i32
    %45 = arith.cmpi ne, %44, %c0_i32_38 : i32
    scf.if %45 {
      %c0_39 = arith.constant 0 : index
      %c0_40 = arith.constant 0 : index
      %c0_41 = arith.constant 0 : index
      %46 = vector.load %arg2[%c0_39, %c0_40, %c0_41] : memref<1x8x32xf32, #tpu.memory_space<vmem>>, vector<1x8x32xf32>
      %47 = vector.shape_cast %46 : vector<1x8x32xf32> to vector<8x32xf32>
      %c0_42 = arith.constant 0 : index
      %c0_43 = arith.constant 0 : index
      %48 = vector.load %arg17[%c0_42, %c0_43] : memref<8x32xf32, #tpu.memory_space<vmem>>, vector<8x32xf32>
      %49 = arith.addf %47, %48 : vector<8x32xf32>
      %c0_44 = arith.constant 0 : index
      %c0_45 = arith.constant 0 : index
      %50 = vector.load %arg6[%c0_44, %c0_45] : memref<1x32xf32, #tpu.memory_space<vmem>>, vector<1x32xf32>
      %51 = vector.shape_cast %50 : vector<1x32xf32> to vector<32xf32>
      %52 = vector.shape_cast %51 : vector<32xf32> to vector<1x32xf32>
      %53 = vector.broadcast %52 : vector<1x32xf32> to vector<8x32xf32>
      %54 = arith.addf %49, %53 : vector<8x32xf32>
      %c0_46 = arith.constant 0 : index
      %c0_47 = arith.constant 0 : index
      %55 = vector.load %arg9[%c0_46, %c0_47] : memref<1x32xf32, #tpu.memory_space<vmem>>, vector<1x32xf32>
      %56 = vector.shape_cast %55 : vector<1x32xf32> to vector<32xf32>
      %c0_48 = arith.constant 0 : index
      %c0_49 = arith.constant 0 : index
      %57 = vector.load %arg10[%c0_48, %c0_49] : memref<1x32xf32, #tpu.memory_space<vmem>>, vector<1x32xf32>
      %58 = vector.shape_cast %57 : vector<1x32xf32> to vector<32xf32>
      %cst_50 = arith.constant dense<0.000000e+00> : vector<8xf32>
      %59 = vector.multi_reduction <add>, %54, %cst_50 [1] : vector<8x32xf32> to vector<8xf32>
      %60 = vector.shape_cast %59 : vector<8xf32> to vector<8x1xf32>
      %cst_51 = arith.constant 3.200000e+01 : f32
      %61 = vector.broadcast %cst_51 : f32 to vector<8x1xf32>
      %62 = arith.divf %60, %61 : vector<8x1xf32>
      %63 = vector.broadcast %62 : vector<8x1xf32> to vector<8x32xf32>
      %64 = arith.subf %54, %63 : vector<8x32xf32>
      %65 = arith.mulf %64, %64 : vector<8x32xf32>
      %cst_52 = arith.constant dense<0.000000e+00> : vector<8xf32>
      %66 = vector.multi_reduction <add>, %65, %cst_52 [1] : vector<8x32xf32> to vector<8xf32>
      %67 = vector.shape_cast %66 : vector<8xf32> to vector<8x1xf32>
      %cst_53 = arith.constant 3.200000e+01 : f32
      %68 = vector.broadcast %cst_53 : f32 to vector<8x1xf32>
      %69 = arith.divf %67, %68 : vector<8x1xf32>
      %70 = vector.broadcast %62 : vector<8x1xf32> to vector<8x32xf32>
      %71 = arith.subf %54, %70 : vector<8x32xf32>
      %cst_54 = arith.constant 9.99999974E-6 : f32
      %72 = vector.broadcast %cst_54 : f32 to vector<8x1xf32>
      %73 = arith.addf %69, %72 : vector<8x1xf32>
      %74 = math.rsqrt %73 : vector<8x1xf32>
      %75 = vector.broadcast %74 : vector<8x1xf32> to vector<8x32xf32>
      %76 = arith.mulf %71, %75 : vector<8x32xf32>
      %77 = vector.shape_cast %56 : vector<32xf32> to vector<1x32xf32>
      %78 = vector.broadcast %77 : vector<1x32xf32> to vector<8x32xf32>
      %79 = arith.mulf %76, %78 : vector<8x32xf32>
      %80 = vector.shape_cast %58 : vector<32xf32> to vector<1x32xf32>
      %81 = vector.broadcast %80 : vector<1x32xf32> to vector<8x32xf32>
      %82 = arith.addf %79, %81 : vector<8x32xf32>
      %c0_55 = arith.constant 0 : index
      %c0_56 = arith.constant 0 : index
      %83 = vector.load %arg11[%c0_55, %c0_56] : memref<32x64xf32, #tpu.memory_space<vmem>>, vector<32x64xf32>
      %cst_57 = arith.constant dense<0.000000e+00> : vector<8x64xf32>
      %84 = tpu.matmul %82, %83, %cst_57 {dimension_numbers = #tpu.dot_dimension_numbers<[1], [0], [0], [1], [0, 0, 1, 1], [], []>} : vector<8x32xf32>, vector<32x64xf32>, vector<8x64xf32> -> vector<8x64xf32>
      %c0_58 = arith.constant 0 : index
      %c0_59 = arith.constant 0 : index
      %85 = vector.load %arg12[%c0_58, %c0_59] : memref<1x64xf32, #tpu.memory_space<vmem>>, vector<1x64xf32>
      %86 = vector.shape_cast %85 : vector<1x64xf32> to vector<64xf32>
      %87 = vector.shape_cast %86 : vector<64xf32> to vector<1x64xf32>
      %88 = vector.broadcast %87 : vector<1x64xf32> to vector<8x64xf32>
      %89 = arith.addf %84, %88 : vector<8x64xf32>
      %cst_60 = arith.constant 5.000000e-01 : f32
      %90 = vector.broadcast %cst_60 : f32 to vector<8x64xf32>
      %91 = arith.mulf %90, %89 : vector<8x64xf32>
      %cst_61 = arith.constant 0.707106769 : f32
      %92 = vector.broadcast %cst_61 : f32 to vector<8x64xf32>
      %93 = arith.mulf %89, %92 : vector<8x64xf32>
      %94 = math.erf %93 : vector<8x64xf32>
      %cst_62 = arith.constant 1.000000e+00 : f32
      %95 = vector.broadcast %cst_62 : f32 to vector<8x64xf32>
      %96 = arith.addf %95, %94 : vector<8x64xf32>
      %97 = arith.mulf %91, %96 : vector<8x64xf32>
      %c0_63 = arith.constant 0 : index
      %c0_64 = arith.constant 0 : index
      %98 = vector.load %arg13[%c0_63, %c0_64] : memref<64x32xf32, #tpu.memory_space<vmem>>, vector<64x32xf32>
      %cst_65 = arith.constant dense<0.000000e+00> : vector<8x32xf32>
      %99 = tpu.matmul %97, %98, %cst_65 {dimension_numbers = #tpu.dot_dimension_numbers<[1], [0], [0], [1], [0, 0, 1, 1], [], []>} : vector<8x64xf32>, vector<64x32xf32>, vector<8x32xf32> -> vector<8x32xf32>
      %100 = arith.addf %54, %99 : vector<8x32xf32>
      %c0_66 = arith.constant 0 : index
      %c0_67 = arith.constant 0 : index
      %101 = vector.load %arg14[%c0_66, %c0_67] : memref<1x32xf32, #tpu.memory_space<vmem>>, vector<1x32xf32>
      %102 = vector.shape_cast %101 : vector<1x32xf32> to vector<32xf32>
      %103 = vector.shape_cast %102 : vector<32xf32> to vector<1x32xf32>
      %104 = vector.broadcast %103 : vector<1x32xf32> to vector<8x32xf32>
      %105 = arith.addf %100, %104 : vector<8x32xf32>
      %c0_68 = arith.constant 0 : index
      %c0_69 = arith.constant 0 : index
      %c0_70 = arith.constant 0 : index
      %106 = vector.load %arg15[%c0_68, %c0_69, %c0_70] : memref<1x8x32xf32, #tpu.memory_space<vmem>>, vector<1x8x32xf32>
      %107 = vector.shape_cast %106 : vector<1x8x32xf32> to vector<8x32xf32>
      %108 = vector.shape_cast %105 : vector<8x32xf32> to vector<1x8x32xf32>
      tpu.vector_store %arg15[%c0_68, %c0_69, %c0_70], %108 {strides = array<i32>} : memref<1x8x32xf32, #tpu.memory_space<vmem>>, vector<1x8x32xf32>,
    } else {
    }
    return
  }
  func.func @transform_0(%arg0: i32, %arg1: i32) -> (i32, i32, i32) {
    %c0_i32 = arith.constant 0 : i32
    %c0_i32_0 = arith.constant 0 : i32
    %c0_i32_1 = arith.constant 0 : i32
    return %arg0, %c0_i32, %c0_i32_0 : i32, i32, i32
  }
  func.func @transform_1(%arg0: i32, %arg1: i32) -> (i32, i32, i32, i32) {
    %c0_i32 = arith.constant 0 : i32
    %c0_i32_0 = arith.constant 0 : i32
    %c0_i32_1 = arith.constant 0 : i32
    %c0_i32_2 = arith.constant 0 : i32
    return %c0_i32, %arg1, %c0_i32_0, %c0_i32_1 : i32, i32, i32, i32
  }
  func.func @transform_2(%arg0: i32, %arg1: i32) -> (i32, i32, i32, i32) {
    %c0_i32 = arith.constant 0 : i32
    %c0_i32_0 = arith.constant 0 : i32
    %c0_i32_1 = arith.constant 0 : i32
    %c0_i32_2 = arith.constant 0 : i32
    return %c0_i32, %arg1, %c0_i32_0, %c0_i32_1 : i32, i32, i32, i32
  }
  func.func @transform_3(%arg0: i32, %arg1: i32) -> (i32, i32, i32) {
    %c0_i32 = arith.constant 0 : i32
    %c0_i32_0 = arith.constant 0 : i32
    %c0_i32_1 = arith.constant 0 : i32
    return %arg1, %c0_i32, %c0_i32_0 : i32, i32, i32
  }
  func.func @transform_4(%arg0: i32, %arg1: i32) -> (i32, i32) {
    %c0_i32 = arith.constant 0 : i32
    %c0_i32_0 = arith.constant 0 : i32
    %c0_i32_1 = arith.constant 0 : i32
    return %c0_i32, %c0_i32_0 : i32, i32
  }
  func.func @transform_5(%arg0: i32, %arg1: i32) -> (i32, i32) {
    %c0_i32 = arith.constant 0 : i32
    %c0_i32_0 = arith.constant 0 : i32
    %c0_i32_1 = arith.constant 0 : i32
    return %c0_i32, %c0_i32_0 : i32, i32
  }
  func.func @transform_6(%arg0: i32, %arg1: i32) -> (i32, i32) {
    %c0_i32 = arith.constant 0 : i32
    %c0_i32_0 = arith.constant 0 : i32
    %c0_i32_1 = arith.constant 0 : i32
    return %c0_i32, %c0_i32_0 : i32, i32
  }
  func.func @transform_7(%arg0: i32, %arg1: i32) -> (i32, i32) {
    %c0_i32 = arith.constant 0 : i32
    %c0_i32_0 = arith.constant 0 : i32
    %c0_i32_1 = arith.constant 0 : i32
    return %c0_i32, %c0_i32_0 : i32, i32
  }
  func.func @transform_8(%arg0: i32, %arg1: i32) -> (i32, i32) {
    %c0_i32 = arith.constant 0 : i32
    %c0_i32_0 = arith.constant 0 : i32
    %c0_i32_1 = arith.constant 0 : i32
    return %c0_i32, %c0_i32_0 : i32, i32
  }
  func.func @transform_9(%arg0: i32, %arg1: i32) -> (i32, i32) {
    %c0_i32 = arith.constant 0 : i32
    %c0_i32_0 = arith.constant 0 : i32
    %c0_i32_1 = arith.constant 0 : i32
    return %c0_i32, %c0_i32_0 : i32, i32
  }
  func.func @transform_10(%arg0: i32, %arg1: i32) -> (i32, i32) {
    %c0_i32 = arith.constant 0 : i32
    %c0_i32_0 = arith.constant 0 : i32
    %c0_i32_1 = arith.constant 0 : i32
    return %c0_i32, %c0_i32_0 : i32, i32
  }
  func.func @transform_11(%arg0: i32, %arg1: i32) -> (i32, i32) {
    %c0_i32 = arith.constant 0 : i32
    %c0_i32_0 = arith.constant 0 : i32
    %c0_i32_1 = arith.constant 0 : i32
    return %c0_i32, %c0_i32_0 : i32, i32
  }
  func.func @transform_12(%arg0: i32, %arg1: i32) -> (i32, i32) {
    %c0_i32 = arith.constant 0 : i32
    %c0_i32_0 = arith.constant 0 : i32
    %c0_i32_1 = arith.constant 0 : i32
    return %c0_i32, %c0_i32_0 : i32, i32
  }
  func.func @transform_13(%arg0: i32, %arg1: i32) -> (i32, i32, i32) {
    %c0_i32 = arith.constant 0 : i32
    %c0_i32_0 = arith.constant 0 : i32
    %c0_i32_1 = arith.constant 0 : i32
    return %arg0, %c0_i32, %c0_i32_0 : i32, i32, i32
  }
}

module attributes {stable_mosaic.version = 11 : i64} {
  func.func @encoder_layer_kernel(%arg0: i32, %arg1: i32, %arg2: memref<1x8x32xf32, #tpu.memory_space<vmem>>, %arg3: memref<3x1x32x8xf32, #tpu.memory_space<vmem>>, %arg4: memref<3x1x1x8xf32, #tpu.memory_space<vmem>>, %arg5: memref<1x8x32xf32, #tpu.memory_space<vmem>>, %arg6: memref<1x32xf32, #tpu.memory_space<vmem>>, %arg7: memref<1x32xf32, #tpu.memory_space<vmem>>, %arg8: memref<1x32xf32, #tpu.memory_space<vmem>>, %arg9: memref<1x32xf32, #tpu.memory_space<vmem>>, %arg10: memref<1x32xf32, #tpu.memory_space<vmem>>, %arg11: memref<32x64xf32, #tpu.memory_space<vmem>>, %arg12: memref<1x64xf32, #tpu.memory_space<vmem>>, %arg13: memref<64x32xf32, #tpu.memory_space<vmem>>, %arg14: memref<1x32xf32, #tpu.memory_space<vmem>>, %arg15: memref<1x8x32xf32, #tpu.memory_space<vmem>>, %arg16: memref<8x32xf32, #tpu.memory_space<vmem>>, %arg17: memref<8x32xf32, #tpu.memory_space<vmem>>) attributes {dimension_semantics = [#tpu.dimension_semantics<parallel>, #tpu.dimension_semantics<arbitrary>], iteration_bounds = array<i64: 2, 4>, scalar_prefetch = 0 : i64, scratch_operands = 2 : i64, tpu.core_type = #tpu.core_type<tc>, window_params = [{transform_indices = @transform_0, window_bounds = array<i64: 1, 8, 32>}, {transform_indices = @transform_1, window_bounds = array<i64: 3, 1, 32, 8>}, {transform_indices = @transform_2, window_bounds = array<i64: 3, 1, 1, 8>}, {transform_indices = @transform_3, window_bounds = array<i64: 1, 8, 32>}, {pipeline_mode = #tpu.pipeline_mode<synchronous>, transform_indices = @transform_4, window_bounds = array<i64: 1, 32>}, {pipeline_mode = #tpu.pipeline_mode<synchronous>, transform_indices = @transform_5, window_bounds = array<i64: 1, 32>}, {pipeline_mode = #tpu.pipeline_mode<synchronous>, transform_indices = @transform_6, window_bounds = array<i64: 1, 32>}, {pipeline_mode = #tpu.pipeline_mode<synchronous>, transform_indices = @transform_7, window_bounds = array<i64: 1, 32>}, {pipeline_mode = #tpu.pipeline_mode<synchronous>, transform_indices = @transform_8, window_bounds = array<i64: 1, 32>}, {pipeline_mode = #tpu.pipeline_mode<synchronous>, transform_indices = @transform_9, window_bounds = array<i64: 32, 64>}, {pipeline_mode = #tpu.pipeline_mode<synchronous>, transform_indices = @transform_10, window_bounds = array<i64: 1, 64>}, {pipeline_mode = #tpu.pipeline_mode<synchronous>, transform_indices = @transform_11, window_bounds = array<i64: 64, 32>}, {pipeline_mode = #tpu.pipeline_mode<synchronous>, transform_indices = @transform_12, window_bounds = array<i64: 1, 32>}, {transform_indices = @transform_13, window_bounds = array<i64: 1, 8, 32>}]} {
    %c0_i32 = arith.constant 0 : i32
    %0 = arith.cmpi eq, %arg1, %c0_i32 : i32
    %1 = arith.extui %0 : i1 to i32
    %c0_i32_0 = arith.constant 0 : i32
    %2 = arith.cmpi ne, %1, %c0_i32_0 : i32
    scf.if %2 {
      %c0_39 = arith.constant 0 : index
      %c0_40 = arith.constant 0 : index
      %c0_41 = arith.constant 0 : index
      %46 = vector.load %arg2[%c0_39, %c0_40, %c0_41] : memref<1x8x32xf32, #tpu.memory_space<vmem>>, vector<1x8x32xf32>
      %47 = vector.shape_cast %46 : vector<1x8x32xf32> to vector<8x32xf32>
      %c0_42 = arith.constant 0 : index
      %c0_43 = arith.constant 0 : index
      %48 = vector.load %arg7[%c0_42, %c0_43] : memref<1x32xf32, #tpu.memory_space<vmem>>, vector<1x32xf32>
      %49 = vector.shape_cast %48 : vector<1x32xf32> to vector<32xf32>
      %c0_44 = arith.constant 0 : index
      %c0_45 = arith.constant 0 : index
      %50 = vector.load %arg8[%c0_44, %c0_45] : memref<1x32xf32, #tpu.memory_space<vmem>>, vector<1x32xf32>
      %51 = vector.shape_cast %50 : vector<1x32xf32> to vector<32xf32>
      %cst_46 = arith.constant dense<0.000000e+00> : vector<8xf32>
      %52 = vector.multi_reduction <add>, %47, %cst_46 [1] : vector<8x32xf32> to vector<8xf32>
      %53 = vector.shape_cast %52 : vector<8xf32> to vector<8x1xf32>
      %cst_47 = arith.constant 3.200000e+01 : f32
      %54 = vector.broadcast %cst_47 : f32 to vector<8x1xf32>
      %55 = arith.divf %53, %54 : vector<8x1xf32>
      %56 = vector.broadcast %55 : vector<8x1xf32> to vector<8x32xf32>
      %57 = arith.subf %47, %56 : vector<8x32xf32>
      %58 = arith.mulf %57, %57 : vector<8x32xf32>
      %cst_48 = arith.constant dense<0.000000e+00> : vector<8xf32>
      %59 = vector.multi_reduction <add>, %58, %cst_48 [1] : vector<8x32xf32> to vector<8xf32>
      %60 = vector.shape_cast %59 : vector<8xf32> to vector<8x1xf32>
      %cst_49 = arith.constant 3.200000e+01 : f32
      %61 = vector.broadcast %cst_49 : f32 to vector<8x1xf32>
      %62 = arith.divf %60, %61 : vector<8x1xf32>
      %63 = vector.broadcast %55 : vector<8x1xf32> to vector<8x32xf32>
      %64 = arith.subf %47, %63 : vector<8x32xf32>
      %cst_50 = arith.constant 9.99999974E-6 : f32
      %65 = vector.broadcast %cst_50 : f32 to vector<8x1xf32>
      %66 = arith.addf %62, %65 : vector<8x1xf32>
      %67 = math.rsqrt %66 : vector<8x1xf32>
      %68 = vector.broadcast %67 : vector<8x1xf32> to vector<8x32xf32>
      %69 = arith.mulf %64, %68 : vector<8x32xf32>
      %70 = vector.shape_cast %49 : vector<32xf32> to vector<1x32xf32>
      %71 = vector.broadcast %70 : vector<1x32xf32> to vector<8x32xf32>
      %72 = arith.mulf %69, %71 : vector<8x32xf32>
      %73 = vector.shape_cast %51 : vector<32xf32> to vector<1x32xf32>
      %74 = vector.broadcast %73 : vector<1x32xf32> to vector<8x32xf32>
      %75 = arith.addf %72, %74 : vector<8x32xf32>
      %c0_51 = arith.constant 0 : index
      %c0_52 = arith.constant 0 : index
      %76 = vector.load %arg16[%c0_51, %c0_52] : memref<8x32xf32, #tpu.memory_space<vmem>>, vector<8x32xf32>
      tpu.vector_store %arg16[%c0_51, %c0_52], %75 {strides = array<i32>} : memref<8x32xf32, #tpu.memory_space<vmem>>, vector<8x32xf32>,
      %cst_53 = arith.constant 0.000000e+00 : f32
      %77 = vector.broadcast %cst_53 : f32 to vector<8x32xf32>
      %c0_54 = arith.constant 0 : index
      %c0_55 = arith.constant 0 : index
      %78 = vector.load %arg17[%c0_54, %c0_55] : memref<8x32xf32, #tpu.memory_space<vmem>>, vector<8x32xf32>
      tpu.vector_store %arg17[%c0_54, %c0_55], %77 {strides = array<i32>} : memref<8x32xf32, #tpu.memory_space<vmem>>, vector<8x32xf32>,
    } else {
    }
    %c0 = arith.constant 0 : index
    %c0_1 = arith.constant 0 : index
    %3 = vector.load %arg16[%c0, %c0_1] : memref<8x32xf32, #tpu.memory_space<vmem>>, vector<8x32xf32>
    %c0_2 = arith.constant 0 : index
    %c0_3 = arith.constant 0 : index
    %c0_4 = arith.constant 0 : index
    %c0_5 = arith.constant 0 : index
    %4 = vector.load %arg3[%c0_2, %c0_3, %c0_4, %c0_5] : memref<3x1x32x8xf32, #tpu.memory_space<vmem>>, vector<1x1x32x8xf32>
    %5 = vector.shape_cast %4 : vector<1x1x32x8xf32> to vector<32x8xf32>
    %cst = arith.constant dense<0.000000e+00> : vector<8x8xf32>
    %6 = tpu.matmul %3, %5, %cst {dimension_numbers = #tpu.dot_dimension_numbers<[1], [0], [0], [1], [0, 0, 1, 1], [], []>} : vector<8x32xf32>, vector<32x8xf32>, vector<8x8xf32> -> vector<8x8xf32>
    %c0_6 = arith.constant 0 : index
    %c0_7 = arith.constant 0 : index
    %c0_8 = arith.constant 0 : index
    %c0_9 = arith.constant 0 : index
    %7 = vector.load %arg4[%c0_6, %c0_7, %c0_8, %c0_9] : memref<3x1x1x8xf32, #tpu.memory_space<vmem>>, vector<1x1x1x8xf32>
    %8 = vector.shape_cast %7 : vector<1x1x1x8xf32> to vector<1x8xf32>
    %9 = vector.broadcast %8 : vector<1x8xf32> to vector<8x8xf32>
    %10 = arith.addf %6, %9 : vector<8x8xf32>
    %c1 = arith.constant 1 : index
    %c0_10 = arith.constant 0 : index
    %c0_11 = arith.constant 0 : index
    %c0_12 = arith.constant 0 : index
    %11 = vector.load %arg3[%c1, %c0_10, %c0_11, %c0_12] : memref<3x1x32x8xf32, #tpu.memory_space<vmem>>, vector<1x1x32x8xf32>
    %12 = vector.shape_cast %11 : vector<1x1x32x8xf32> to vector<32x8xf32>
    %cst_13 = arith.constant dense<0.000000e+00> : vector<8x8xf32>
    %13 = tpu.matmul %3, %12, %cst_13 {dimension_numbers = #tpu.dot_dimension_numbers<[1], [0], [0], [1], [0, 0, 1, 1], [], []>} : vector<8x32xf32>, vector<32x8xf32>, vector<8x8xf32> -> vector<8x8xf32>
    %c1_14 = arith.constant 1 : index
    %c0_15 = arith.constant 0 : index
    %c0_16 = arith.constant 0 : index
    %c0_17 = arith.constant 0 : index
    %14 = vector.load %arg4[%c1_14, %c0_15, %c0_16, %c0_17] : memref<3x1x1x8xf32, #tpu.memory_space<vmem>>, vector<1x1x1x8xf32>
    %15 = vector.shape_cast %14 : vector<1x1x1x8xf32> to vector<1x8xf32>
    %16 = vector.broadcast %15 : vector<1x8xf32> to vector<8x8xf32>
    %17 = arith.addf %13, %16 : vector<8x8xf32>
    %c2 = arith.constant 2 : index
    %c0_18 = arith.constant 0 : index
    %c0_19 = arith.constant 0 : index
    %c0_20 = arith.constant 0 : index
    %18 = vector.load %arg3[%c2, %c0_18, %c0_19, %c0_20] : memref<3x1x32x8xf32, #tpu.memory_space<vmem>>, vector<1x1x32x8xf32>
    %19 = vector.shape_cast %18 : vector<1x1x32x8xf32> to vector<32x8xf32>
    %cst_21 = arith.constant dense<0.000000e+00> : vector<8x8xf32>
    %20 = tpu.matmul %3, %19, %cst_21 {dimension_numbers = #tpu.dot_dimension_numbers<[1], [0], [0], [1], [0, 0, 1, 1], [], []>} : vector<8x32xf32>, vector<32x8xf32>, vector<8x8xf32> -> vector<8x8xf32>
    %c2_22 = arith.constant 2 : index
    %c0_23 = arith.constant 0 : index
    %c0_24 = arith.constant 0 : index
    %c0_25 = arith.constant 0 : index
    %21 = vector.load %arg4[%c2_22, %c0_23, %c0_24, %c0_25] : memref<3x1x1x8xf32, #tpu.memory_space<vmem>>, vector<1x1x1x8xf32>
    %22 = vector.shape_cast %21 : vector<1x1x1x8xf32> to vector<1x8xf32>
    %23 = vector.broadcast %22 : vector<1x8xf32> to vector<8x8xf32>
    %24 = arith.addf %20, %23 : vector<8x8xf32>
    %cst_26 = arith.constant dense<0.000000e+00> : vector<8x8xf32>
    %25 = tpu.matmul %10, %17, %cst_26 {dimension_numbers = #tpu.dot_dimension_numbers<[1], [1], [0], [0], [0, 0, 1, 0], [], []>} : vector<8x8xf32>, vector<8x8xf32>, vector<8x8xf32> -> vector<8x8xf32>
    %cst_27 = arith.constant dense<0xFF800000> : vector<8xf32>
    %26 = vector.multi_reduction <maximumf>, %25, %cst_27 [1] : vector<8x8xf32> to vector<8xf32>
    %27 = vector.shape_cast %26 : vector<8xf32> to vector<8x1xf32>
    %28 = vector.broadcast %27 : vector<8x1xf32> to vector<8x8xf32>
    %29 = arith.subf %25, %28 : vector<8x8xf32>
    %30 = math.exp %29 : vector<8x8xf32>
    %cst_28 = arith.constant dense<0.000000e+00> : vector<8xf32>
    %31 = vector.multi_reduction <add>, %30, %cst_28 [1] : vector<8x8xf32> to vector<8xf32>
    %32 = vector.shape_cast %31 : vector<8xf32> to vector<8x1xf32>
    %33 = tpu.reciprocal %32 {approx = true} : vector<8x1xf32> -> vector<8x1xf32>
    %34 = vector.broadcast %33 : vector<8x1xf32> to vector<8x8xf32>
    %35 = arith.mulf %30, %34 : vector<8x8xf32>
    %cst_29 = arith.constant dense<0.000000e+00> : vector<8x8xf32>
    %36 = tpu.matmul %35, %24, %cst_29 {dimension_numbers = #tpu.dot_dimension_numbers<[1], [0], [0], [1], [0, 0, 1, 1], [], []>} : vector<8x8xf32>, vector<8x8xf32>, vector<8x8xf32> -> vector<8x8xf32>
    %c0_30 = arith.constant 0 : index
    %c0_31 = arith.constant 0 : index
    %37 = vector.load %arg17[%c0_30, %c0_31] : memref<8x32xf32, #tpu.memory_space<vmem>>, vector<8x32xf32>
    %c0_32 = arith.constant 0 : index
    %c0_33 = arith.constant 0 : index
    %c0_34 = arith.constant 0 : index
    %38 = vector.load %arg5[%c0_32, %c0_33, %c0_34] : memref<1x8x32xf32, #tpu.memory_space<vmem>>, vector<1x8x32xf32>
    %39 = vector.shape_cast %38 : vector<1x8x32xf32> to vector<8x32xf32>
    %cst_35 = arith.constant dense<0.000000e+00> : vector<8x32xf32>
    %40 = tpu.matmul %36, %39, %cst_35 {dimension_numbers = #tpu.dot_dimension_numbers<[1], [0], [0], [1], [0, 0, 1, 1], [], []>} : vector<8x8xf32>, vector<8x32xf32>, vector<8x32xf32> -> vector<8x32xf32>
    %41 = arith.addf %37, %40 : vector<8x32xf32>
    %c0_36 = arith.constant 0 : index
    %c0_37 = arith.constant 0 : index
    %42 = vector.load %arg17[%c0_36, %c0_37] : memref<8x32xf32, #tpu.memory_space<vmem>>, vector<8x32xf32>
    tpu.vector_store %arg17[%c0_36, %c0_37], %41 {strides = array<i32>} : memref<8x32xf32, #tpu.memory_space<vmem>>, vector<8x32xf32>,
    %c3_i32 = arith.constant 3 : i32
    %43 = arith.cmpi eq, %arg1, %c3_i32 : i32
    %44 = arith.extui %43 : i1 to i32
    %c0_i32_38 = arith.constant 0 : i32
    %45 = arith.cmpi ne, %44, %c0_i32_38 : i32
    scf.if %45 {
      %c0_39 = arith.constant 0 : index
      %c0_40 = arith.constant 0 : index
      %c0_41 = arith.constant 0 : index
      %46 = vector.load %arg2[%c0_39, %c0_40, %c0_41] : memref<1x8x32xf32, #tpu.memory_space<vmem>>, vector<1x8x32xf32>
      %47 = vector.shape_cast %46 : vector<1x8x32xf32> to vector<8x32xf32>
      %c0_42 = arith.constant 0 : index
      %c0_43 = arith.constant 0 : index
      %48 = vector.load %arg17[%c0_42, %c0_43] : memref<8x32xf32, #tpu.memory_space<vmem>>, vector<8x32xf32>
      %49 = arith.addf %47, %48 : vector<8x32xf32>
      %c0_44 = arith.constant 0 : index
      %c0_45 = arith.constant 0 : index
      %50 = vector.load %arg6[%c0_44, %c0_45] : memref<1x32xf32, #tpu.memory_space<vmem>>, vector<1x32xf32>
      %51 = vector.shape_cast %50 : vector<1x32xf32> to vector<32xf32>
      %52 = vector.shape_cast %51 : vector<32xf32> to vector<1x32xf32>
      %53 = vector.broadcast %52 : vector<1x32xf32> to vector<8x32xf32>
      %54 = arith.addf %49, %53 : vector<8x32xf32>
      %c0_46 = arith.constant 0 : index
      %c0_47 = arith.constant 0 : index
      %55 = vector.load %arg9[%c0_46, %c0_47] : memref<1x32xf32, #tpu.memory_space<vmem>>, vector<1x32xf32>
      %56 = vector.shape_cast %55 : vector<1x32xf32> to vector<32xf32>
      %c0_48 = arith.constant 0 : index
      %c0_49 = arith.constant 0 : index
      %57 = vector.load %arg10[%c0_48, %c0_49] : memref<1x32xf32, #tpu.memory_space<vmem>>, vector<1x32xf32>
      %58 = vector.shape_cast %57 : vector<1x32xf32> to vector<32xf32>
      %cst_50 = arith.constant dense<0.000000e+00> : vector<8xf32>
      %59 = vector.multi_reduction <add>, %54, %cst_50 [1] : vector<8x32xf32> to vector<8xf32>
      %60 = vector.shape_cast %59 : vector<8xf32> to vector<8x1xf32>
      %cst_51 = arith.constant 3.200000e+01 : f32
      %61 = vector.broadcast %cst_51 : f32 to vector<8x1xf32>
      %62 = arith.divf %60, %61 : vector<8x1xf32>
      %63 = vector.broadcast %62 : vector<8x1xf32> to vector<8x32xf32>
      %64 = arith.subf %54, %63 : vector<8x32xf32>
      %65 = arith.mulf %64, %64 : vector<8x32xf32>
      %cst_52 = arith.constant dense<0.000000e+00> : vector<8xf32>
      %66 = vector.multi_reduction <add>, %65, %cst_52 [1] : vector<8x32xf32> to vector<8xf32>
      %67 = vector.shape_cast %66 : vector<8xf32> to vector<8x1xf32>
      %cst_53 = arith.constant 3.200000e+01 : f32
      %68 = vector.broadcast %cst_53 : f32 to vector<8x1xf32>
      %69 = arith.divf %67, %68 : vector<8x1xf32>
      %70 = vector.broadcast %62 : vector<8x1xf32> to vector<8x32xf32>
      %71 = arith.subf %54, %70 : vector<8x32xf32>
      %cst_54 = arith.constant 9.99999974E-6 : f32
      %72 = vector.broadcast %cst_54 : f32 to vector<8x1xf32>
      %73 = arith.addf %69, %72 : vector<8x1xf32>
      %74 = math.rsqrt %73 : vector<8x1xf32>
      %75 = vector.broadcast %74 : vector<8x1xf32> to vector<8x32xf32>
      %76 = arith.mulf %71, %75 : vector<8x32xf32>
      %77 = vector.shape_cast %56 : vector<32xf32> to vector<1x32xf32>
      %78 = vector.broadcast %77 : vector<1x32xf32> to vector<8x32xf32>
      %79 = arith.mulf %76, %78 : vector<8x32xf32>
      %80 = vector.shape_cast %58 : vector<32xf32> to vector<1x32xf32>
      %81 = vector.broadcast %80 : vector<1x32xf32> to vector<8x32xf32>
      %82 = arith.addf %79, %81 : vector<8x32xf32>
      %c0_55 = arith.constant 0 : index
      %c0_56 = arith.constant 0 : index
      %83 = vector.load %arg11[%c0_55, %c0_56] : memref<32x64xf32, #tpu.memory_space<vmem>>, vector<32x64xf32>
      %cst_57 = arith.constant dense<0.000000e+00> : vector<8x64xf32>
      %84 = tpu.matmul %82, %83, %cst_57 {dimension_numbers = #tpu.dot_dimension_numbers<[1], [0], [0], [1], [0, 0, 1, 1], [], []>} : vector<8x32xf32>, vector<32x64xf32>, vector<8x64xf32> -> vector<8x64xf32>
      %c0_58 = arith.constant 0 : index
      %c0_59 = arith.constant 0 : index
      %85 = vector.load %arg12[%c0_58, %c0_59] : memref<1x64xf32, #tpu.memory_space<vmem>>, vector<1x64xf32>
      %86 = vector.shape_cast %85 : vector<1x64xf32> to vector<64xf32>
      %87 = vector.shape_cast %86 : vector<64xf32> to vector<1x64xf32>
      %88 = vector.broadcast %87 : vector<1x64xf32> to vector<8x64xf32>
      %89 = arith.addf %84, %88 : vector<8x64xf32>
      %cst_60 = arith.constant 5.000000e-01 : f32
      %90 = vector.broadcast %cst_60 : f32 to vector<8x64xf32>
      %91 = arith.mulf %90, %89 : vector<8x64xf32>
      %cst_61 = arith.constant 0.707106769 : f32
      %92 = vector.broadcast %cst_61 : f32 to vector<8x64xf32>
      %93 = arith.mulf %89, %92 : vector<8x64xf32>
      %94 = math.erf %93 : vector<8x64xf32>
      %cst_62 = arith.constant 1.000000e+00 : f32
      %95 = vector.broadcast %cst_62 : f32 to vector<8x64xf32>
      %96 = arith.addf %95, %94 : vector<8x64xf32>
      %97 = arith.mulf %91, %96 : vector<8x64xf32>
      %c0_63 = arith.constant 0 : index
      %c0_64 = arith.constant 0 : index
      %98 = vector.load %arg13[%c0_63, %c0_64] : memref<64x32xf32, #tpu.memory_space<vmem>>, vector<64x32xf32>
      %cst_65 = arith.constant dense<0.000000e+00> : vector<8x32xf32>
      %99 = tpu.matmul %97, %98, %cst_65 {dimension_numbers = #tpu.dot_dimension_numbers<[1], [0], [0], [1], [0, 0, 1, 1], [], []>} : vector<8x64xf32>, vector<64x32xf32>, vector<8x32xf32> -> vector<8x32xf32>
      %100 = arith.addf %54, %99 : vector<8x32xf32>
      %c0_66 = arith.constant 0 : index
      %c0_67 = arith.constant 0 : index
      %101 = vector.load %arg14[%c0_66, %c0_67] : memref<1x32xf32, #tpu.memory_space<vmem>>, vector<1x32xf32>
      %102 = vector.shape_cast %101 : vector<1x32xf32> to vector<32xf32>
      %103 = vector.shape_cast %102 : vector<32xf32> to vector<1x32xf32>
      %104 = vector.broadcast %103 : vector<1x32xf32> to vector<8x32xf32>
      %105 = arith.addf %100, %104 : vector<8x32xf32>
      %c0_68 = arith.constant 0 : index
      %c0_69 = arith.constant 0 : index
      %c0_70 = arith.constant 0 : index
      %106 = vector.load %arg15[%c0_68, %c0_69, %c0_70] : memref<1x8x32xf32, #tpu.memory_space<vmem>>, vector<1x8x32xf32>
      %107 = vector.shape_cast %106 : vector<1x8x32xf32> to vector<8x32xf32>
      %108 = vector.shape_cast %105 : vector<8x32xf32> to vector<1x8x32xf32>
      tpu.vector_store %arg15[%c0_68, %c0_69, %c0_70], %108 {strides = array<i32>} : memref<1x8x32xf32, #tpu.memory_space<vmem>>, vector<1x8x32xf32>,
    } else {
    }
    return
  }
  func.func @transform_0(%arg0: i32, %arg1: i32) -> (i32, i32, i32) {
    %c0_i32 = arith.constant 0 : i32
    %c0_i32_0 = arith.constant 0 : i32
    %c0_i32_1 = arith.constant 0 : i32
    return %arg0, %c0_i32, %c0_i32_0 : i32, i32, i32
  }
  func.func @transform_1(%arg0: i32, %arg1: i32) -> (i32, i32, i32, i32) {
    %c0_i32 = arith.constant 0 : i32
    %c0_i32_0 = arith.constant 0 : i32
    %c0_i32_1 = arith.constant 0 : i32
    %c0_i32_2 = arith.constant 0 : i32
    return %c0_i32, %arg1, %c0_i32_0, %c0_i32_1 : i32, i32, i32, i32
  }
  func.func @transform_2(%arg0: i32, %arg1: i32) -> (i32, i32, i32, i32) {
    %c0_i32 = arith.constant 0 : i32
    %c0_i32_0 = arith.constant 0 : i32
    %c0_i32_1 = arith.constant 0 : i32
    %c0_i32_2 = arith.constant 0 : i32
    return %c0_i32, %arg1, %c0_i32_0, %c0_i32_1 : i32, i32, i32, i32
  }
  func.func @transform_3(%arg0: i32, %arg1: i32) -> (i32, i32, i32) {
    %c0_i32 = arith.constant 0 : i32
    %c0_i32_0 = arith.constant 0 : i32
    %c0_i32_1 = arith.constant 0 : i32
    return %arg1, %c0_i32, %c0_i32_0 : i32, i32, i32
  }
  func.func @transform_4(%arg0: i32, %arg1: i32) -> (i32, i32) {
    %c0_i32 = arith.constant 0 : i32
    %c0_i32_0 = arith.constant 0 : i32
    %c0_i32_1 = arith.constant 0 : i32
    return %c0_i32, %c0_i32_0 : i32, i32
  }
  func.func @transform_5(%arg0: i32, %arg1: i32) -> (i32, i32) {
    %c0_i32 = arith.constant 0 : i32
    %c0_i32_0 = arith.constant 0 : i32
    %c0_i32_1 = arith.constant 0 : i32
    return %c0_i32, %c0_i32_0 : i32, i32
  }
  func.func @transform_6(%arg0: i32, %arg1: i32) -> (i32, i32) {
    %c0_i32 = arith.constant 0 : i32
    %c0_i32_0 = arith.constant 0 : i32
    %c0_i32_1 = arith.constant 0 : i32
    return %c0_i32, %c0_i32_0 : i32, i32
  }
  func.func @transform_7(%arg0: i32, %arg1: i32) -> (i32, i32) {
    %c0_i32 = arith.constant 0 : i32
    %c0_i32_0 = arith.constant 0 : i32
    %c0_i32_1 = arith.constant 0 : i32
    return %c0_i32, %c0_i32_0 : i32, i32
  }
  func.func @transform_8(%arg0: i32, %arg1: i32) -> (i32, i32) {
    %c0_i32 = arith.constant 0 : i32
    %c0_i32_0 = arith.constant 0 : i32
    %c0_i32_1 = arith.constant 0 : i32
    return %c0_i32, %c0_i32_0 : i32, i32
  }
  func.func @transform_9(%arg0: i32, %arg1: i32) -> (i32, i32) {
    %c0_i32 = arith.constant 0 : i32
    %c0_i32_0 = arith.constant 0 : i32
    %c0_i32_1 = arith.constant 0 : i32
    return %c0_i32, %c0_i32_0 : i32, i32
  }
  func.func @transform_10(%arg0: i32, %arg1: i32) -> (i32, i32) {
    %c0_i32 = arith.constant 0 : i32
    %c0_i32_0 = arith.constant 0 : i32
    %c0_i32_1 = arith.constant 0 : i32
    return %c0_i32, %c0_i32_0 : i32, i32
  }
  func.func @transform_11(%arg0: i32, %arg1: i32) -> (i32, i32) {
    %c0_i32 = arith.constant 0 : i32
    %c0_i32_0 = arith.constant 0 : i32
    %c0_i32_1 = arith.constant 0 : i32
    return %c0_i32, %c0_i32_0 : i32, i32
  }
  func.func @transform_12(%arg0: i32, %arg1: i32) -> (i32, i32) {
    %c0_i32 = arith.constant 0 : i32
    %c0_i32_0 = arith.constant 0 : i32
    %c0_i32_1 = arith.constant 0 : i32
    return %c0_i32, %c0_i32_0 : i32, i32
  }
  func.func @transform_13(%arg0: i32, %arg1: i32) -> (i32, i32, i32) {
    %c0_i32 = arith.constant 0 : i32
    %c0_i32_0 = arith.constant 0 : i32
    %c0_i32_1 = arith.constant 0 : i32
    return %arg0, %c0_i32, %c0_i32_0 : i32, i32, i32
  }
}

</mosaic_0001>

<bundles_post_ra>
// kernel: transformer_encoder.2
= control target key start
LH: loop header
LB: loop body
LE: loop exit
PB: predicated region body
PF: predicated region fallthrough
CT: control target
= control target key end

     0   :  { %s2079_s0 = inlined_call_operand.vmem [shape: f32[2,8,32], index: 0, kind: input, shape index: {}]   ;;  %s2080_s1 = inlined_call_operand.vmem [shape: f32[3,4,32,8], index: 1, kind: input, shape index: {}]   ;;  %s2081_s2 = inlined_call_operand.vmem [shape: f32[3,4,1,8], index: 2, kind: input, shape index: {}]   ;;  %s2082_s3 = inlined_call_operand.vmem [shape: f32[4,8,32], index: 3, kind: input, shape index: {}]   ;;  %s2083_s4 = inlined_call_operand.vmem [shape: f32[1,32], index: 4, kind: input, shape index: {}]   ;;  %s2084_s5 = inlined_call_operand.vmem [shape: f32[1,32], index: 5, kind: input, shape index: {}]   ;;  %s2085_s6 = inlined_call_operand.vmem [shape: f32[1,32], index: 6, kind: input, shape index: {}]   ;;  %s2086_s7 = inlined_call_operand.vmem [shape: f32[1,32], index: 7, kind: input, shape index: {}]   ;;  %s2087_s8 = inlined_call_operand.vmem [shape: f32[1,32], index: 8, kind: input, shape index: {}]   ;;  %s2088_s9 = inlined_call_operand.vmem [shape: f32[32,64], index: 9, kind: input, shape index: {}]   ;;  %s2089_s10 = inlined_call_operand.vmem [shape: f32[1,64], index: 10, kind: input, shape index: {}]   ;;  %s2090_s11 = inlined_call_operand.vmem [shape: f32[64,32], index: 11, kind: input, shape index: {}]   ;;  %s2091_s12 = inlined_call_operand.vmem [shape: f32[1,32], index: 12, kind: input, shape index: {}]   ;;  %s2092_s13 = inlined_call_operand.vmem [shape: f32[2,8,32], index: 13, kind: output, shape index: {}]  }
   0x1   :  { %2097 = sst [smem:[#allocation12_spill]] %s2080_s1 }
   0x2   :  { %2098 = sst [smem:[#allocation13_spill]] %s2081_s2 }
   0x3   :  { %s1855_s25 = smov 0   ;;  %s1857_s26 = smov 0  }
   0x4   :  { %s1859_s27 = smov 0   ;;  %s1861_s28 = smov 0  }
   0x5   :  { %s1863_s29 = smov 0   ;;  %s1865_s30 = smov 0  }
   0x6   :  { %s1867_s14 = smov 0  }
   0x7 LB: > { %2099 = sst [smem:[#allocation6_spill]] %s1758_s26  ;;  %s32_s15 = sadd.s32 1, %s1770_s29  ;;  %s1778_s14 = sphi %s1867_s14, %s23_s14   ;;  %s1774_s30 = sphi %s1865_s30, %s2113_s30   ;;  %s1770_s29 = sphi %s1863_s29, %s2112_s29   ;;  %s1766_s28 = sphi %s1861_s28, %s2111_s28   ;;  %s1762_s27 = sphi %s1859_s27, %s2110_s27   ;;  %s1758_s26 = sphi %s1857_s26, %s2109_s26   ;;  %s1754_s25 = sphi %s1855_s25, %s2108_s25  }
   0x8   : > { %2100 = sst [smem:[#allocation7_spill]] %s1770_s29  ;;  %s35_s16 = sadd.s32 1, %s1774_s30 }
   0x9   : > { %2101 = sst [smem:[#allocation8_spill]] %s1774_s30  ;;  %p33_p0 = scmp.ge.s32.totalorder %s32_s15, 4 }
   0xa   : > { %s68_s17 = sadd.s32 1, %s1758_s26  ;;  %p75_p1 = scmp.ne.s32.totalorder %s1758_s26, %s1754_s25 }
   0xb   : > { %p76_p2 = scmp.eq.s32.totalorder %s1778_s14, 0  ;;  %s2115_s15 = smov (%p33_p0, %s32_s15), 0 }
   0xc   : > { %2102 = sst [smem:[#allocation9_spill]] %s2115_s15  ;;  %s2117_s16 = smov (!%p33_p0, %s35_s16), %s1774_s30 }
   0xd   : > { %s65_s18 = ssub.s32 %s1770_s29, %s2115_s15  ;;  %p1901_p3 = por %p76_p2, %p75_p1 }
   0xe   : > { %p37_p4 = scmp.ge.s32.totalorder %s2117_s16, 2  ;;  %p66_p5 = scmp.eq.s32.totalorder %s65_s18, 0 }
   0xf   : > { %p1495_p6 = scmp.ge.s32.totalorder %s1778_s14, 8 }
  0x10   : > { %s2119_s16 = smov (%p37_p4, %s2117_s16), 0 }
  0x11   : > { %2104 = sst [smem:[#allocation10_spill]] %s2119_s16  ;;  %395 = sbr.rel (%p1495_p6) target bundleno = 50 (0x32), region = 52 }
  0x12   : > { %s1908_s20 = scalar_select %p66_p5, %s1758_s26, %s68_s17  }
  0x14   : > { %2105 = sst [smem:[#allocation11_spill]] %s1908_s20 }
  0x16   : > { %405 = sbr.rel (!%p1901_p3) target bundleno = 39 (0x27), region = 60  ;;  %s407_s21 = sand.u32 (%p1901_p3), 1, %s1758_s26  }
  0x17   : > { %s1535_s22 = sshll.u32 (%p1901_p3), %s1770_s29, 5  ;;  %s1649_s23 = smul.u32 (%p1901_p3), 96, %s407_s21 }
  0x18   : > { %s2106_s1 = sld [smem:[#allocation12_spill]] (%p1901_p3) }
  0x19   : > { %s409_s17 = scalar_lea.vmem (%p1901_p3), [#allocation4], %s1649_s23 }
  0x1e   : > { %s412_s30 = scalar_lea.vmem %s2106_s1, %s1535_s22 }
  0x1f   : > { %v463_v0 = vld [vmem:[%s412_s30] sm:$0xff]  ;;  %v465_v1 = vld [vmem:[%s412_s30 + $0x8] sm:$0xff]  ;;  %v467_v2 = vld [vmem:[%s412_s30 + $0x10] sm:$0xff] }
  0x20   : > { %v469_v3 = vld [vmem:[%s412_s30 + $0x18] sm:$0xff]  ;;  %v471_v4 = vld [vmem:[%s412_s30 + $0x80] sm:$0xff]  ;;  %v473_v5 = vld [vmem:[%s412_s30 + $0x88] sm:$0xff]  ;;  %464 = vst [vmem:[%s409_s17] sm:$0xff] %v463_v0 }
  0x21   : > { %466 = vst [vmem:[%s409_s17 + $0x8] sm:$0xff] %v465_v1  ;;  %468 = vst [vmem:[%s409_s17 + $0x10] sm:$0xff] %v467_v2  ;;  %v475_v6 = vld [vmem:[%s412_s30 + $0x90] sm:$0xff]  ;;  %v477_v7 = vld [vmem:[%s412_s30 + $0x98] sm:$0xff] }
  0x22   : > { %470 = vst [vmem:[%s409_s17 + $0x18] sm:$0xff] %v469_v3  ;;  %472 = vst [vmem:[%s409_s17 + $0x20] sm:$0xff] %v471_v4  ;;  %v479_v8 = vld [vmem:[%s412_s30 + $0x100] sm:$0xff]  ;;  %v481_v9 = vld [vmem:[%s412_s30 + $0x108] sm:$0xff] }
  0x23   : > { %474 = vst [vmem:[%s409_s17 + $0x28] sm:$0xff] %v473_v5  ;;  %476 = vst [vmem:[%s409_s17 + $0x30] sm:$0xff] %v475_v6  ;;  %v483_v10 = vld [vmem:[%s412_s30 + $0x110] sm:$0xff]  ;;  %v485_v11 = vld [vmem:[%s412_s30 + $0x118] sm:$0xff] }
  0x24   : > { %478 = vst [vmem:[%s409_s17 + $0x38] sm:$0xff] %v477_v7  ;;  %480 = vst [vmem:[%s409_s17 + $0x40] sm:$0xff] %v479_v8 }
  0x25   : > { %482 = vst [vmem:[%s409_s17 + $0x48] sm:$0xff] %v481_v9  ;;  %484 = vst [vmem:[%s409_s17 + $0x50] sm:$0xff] %v483_v10 }
  0x26   : > { %486 = vst [vmem:[%s409_s17 + $0x58] sm:$0xff] %v485_v11 }
  0x27 PF: > { %492 = sbr.rel (!%p1901_p3) target bundleno = 50 (0x32), region = 98  ;;  %s494_s15 = sand.u32 (%p1901_p3), 1, %s1758_s26  }
  0x28   : > { %s2107_s2 = sld [smem:[#allocation13_spill]] (%p1901_p3)  ;;  %s1650_s23 = smul.u32 (%p1901_p3), 3, %s494_s15 }
  0x2a   : > { %s496_s24 = scalar_lea.vmem (%p1901_p3), [#allocation5], %s1650_s23 }
  0x2e   : > { %s497_s22 = scalar_lea.vmem %s2107_s2, %s1770_s29 }
  0x2f   : > { %v514_v12 = vld [vmem:[%s497_s22] sm:$0x1]  ;;  %v516_v13 = vld [vmem:[%s497_s22 + $0x4] sm:$0x1]  ;;  %v518_v14 = vld [vmem:[%s497_s22 + $0x8] sm:$0x1] }
  0x30   : > { %515 = vst [vmem:[%s496_s24] sm:$0x1] %v514_v12  ;;  %517 = vst [vmem:[%s496_s24 + $0x1] sm:$0x1] %v516_v13 }
  0x31   : > { %519 = vst [vmem:[%s496_s24 + $0x2] sm:$0x1] %v518_v14 }
  0x32 PF: > { %p1498_p7 = scmp.ge.s32.totalorder %s1778_s14, 1  ;;  %p547_p8 = scmp.lt.s32.totalorder %s1778_s14, 9 }
  0x34   : > { %p548_p9 = pnand %p1498_p7, %p547_p8 }
  0x35   : > { %s554_s30 = sand.u32 (!%p548_p9), 1, %s1754_s25   ;;  %p615_p10 = scmp.lt.s32.totalorder (!%p548_p9), %s1766_s28, 1 }
  0x36   : > { %551 = sbr.rel (%p548_p9) target bundleno = 2207 (0x89f), region = 136  ;;  %p619_p11 = scmp.lt.s32.totalorder (!%p548_p9), %s1762_s27, 3 }
  0x37   : > { %s1651_s19 = smul.u32 (!%p548_p9), 96, %s554_s30  ;;  %p1502_p12 = scmp.ne.s32.totalorder (!%p548_p9), %s1762_s27, 0 }
  0x38   : > { %s1652_s17 = smul.u32 (!%p548_p9), 3, %s554_s30 }
  0x39   : > { %s1947_s30 = scalar_lea.vmem (!%p548_p9), [#allocation4], %s1651_s19 }
  0x3a   : > { %s1949_s26 = scalar_lea.vmem (!%p548_p9), [#allocation5], %s1652_s17 }
  0x3b   : > { %s2121_s28 = smov (!%p615_p10, %s1766_s28), 1  ;;  %630 = sbr.rel (%p1502_p12) target bundleno = 374 (0x176), region = 148 }
  0x3c   : > { %s620_s15 = scalar_select %p619_p11, %s1762_s27, 3 }
  0x3d   : > { %s1499_s18 = sshll.u32 %s2121_s28, 3 }
  0x3e   : > { %s1935_s23 = scalar_lea.vmem %s2079_s0, %s1499_s18  ;;  %s1500_s24 = sshll.u32 %s620_s15, 3 }
  0x3f   : > { %s1940_s16 = scalar_lea.vmem %s2082_s3, %s1500_s24  ;;  %s1945_s20 = scalar_lea.vmem %s2092_s13, %s1499_s18 }
  0x40   : > { %v631_v15 = vld [vmem:[%s1935_s23] sm:$0xff]  ;;  %vm634_vm0 = vcmask 261120   ;;  %v1780_v17 = vmov 0.0  }
  0x41   : > { %v635_v16 = vsel %vm634_vm0, %v631_v15, 0.0  ;;  %664 = vst.msk [vmem:[#allocation3] sm:$0xff] %vm634_vm0, %v1780_v17  ;;  %v1503_v27 = vld [vmem:[%s2084_s5] ss:$0 sm:$0xff] }
  0x42   : > { %636 = vadd.xlane.f32.xlu0 %v635_v16  ;;  %v1504_v29 = vld [vmem:[%s2085_s6] ss:$0 sm:$0xff] }
  0xcb   : > { %v637_v18 = vpop.xlane.xlu0 %636 }
  0xcc   : > { %v639_v19 = vmul.f32 0.03125, %v637_v18 }
  0xce   : > { %v640_v20 = vsub.f32 %v631_v15, %v639_v19 }
  0xd0   : > { %v641_v21 = vmul.f32 %v640_v20, %v640_v20 }
  0xd2   : > { %v642_v22 = vsel %vm634_vm0, %v641_v21, 0.0 }
  0xd3   : > { %643 = vadd.xlane.f32.xlu0 %v642_v22 }
 0x15c   : > { %v644_v23 = vpop.xlane.xlu0 %643 }
 0x15d   : > { %v645_v24 = vmul.f32 0.03125, %v644_v23 }
 0x15f   : > { %v646_v25 = vadd.f32 1e-05, %v645_v24 }
 0x161   : > { %1714 = vrsqrt.f32 %v646_v25 }
 0x16e   : > { %v1715_v26 = vpop.eup %1714 }
 0x16f   : > { %v648_v28 = vmul.f32 %v1715_v26, %v640_v20 }
 0x171   : > { %v655_v30 = vmul.f32 %v1503_v27, %v648_v28 }
 0x173   : > { %v662_v31 = vadd.f32 %v1504_v29, %v655_v30 }
 0x175   : > { %663 = vst.msk [vmem:[#allocation2] sm:$0xff] %vm634_vm0, %v662_v31 }
 0x176 PF: > { %v1510_v32 = vld [vmem:[%s1947_s30 + $0x38] sm:$0xff]  ;;  %v1781_v34 = vmov 0.0   ;;  %v1509_v35 = vld [vmem:[%s1947_s30 + $0x30] sm:$0xff]  ;;  %v1508_v37 = vld [vmem:[%s1947_s30 + $0x28] sm:$0xff]  ;;  %vm677_vm1 = vcmask 261120   ;;  %vm1782_vm2 = vmmov 0  }
 0x177   : > { %v669_v33 = vld [vmem:[%s1947_s30 + $0x18] sm:$0xff]  ;;  %1582 = vmatprep.subr.mxu1 %v1781_v34  ;;  %1571 = vmatprep.subr.mxu0 %v1781_v34  ;;  %v668_v36 = vld [vmem:[%s1947_s30 + $0x10] sm:$0xff]  ;;  %v667_v38 = vld [vmem:[%s1947_s30 + $0x8] sm:$0xff]  ;;  %vm917_vm3 = vcmask 64512   ;;  %p1525_p13 = scmp.ne.s32.totalorder %s1762_s27, 3 }
 0x178   : > { %1583 = vmatpush3.msra.mxu1 %v1510_v32  ;;  %1572 = vmatpush3.msra.mxu0 %v669_v33  ;;  %v1507_v39 = vld [vmem:[%s1947_s30 + $0x20] sm:$0xff]  ;;  %v1517_v50 = vld [vmem:[%s1947_s30 + $0x58] sm:$0xff]  ;;  %v1516_v51 = vld [vmem:[%s1947_s30 + $0x50] sm:$0xff] }
 0x179   : > { %1584 = vmatprep.subr.mxu1 %v1781_v34  ;;  %1573 = vmatprep.subr.mxu0 %v1781_v34  ;;  %v666_v41 = vld [vmem:[%s1947_s30] sm:$0xff]  ;;  %v1515_v52 = vld [vmem:[%s1947_s30 + $0x48] sm:$0xff]  ;;  %v1079_v2 = vld [vmem:[%s1940_s16] sm:$0xff] }
 0x17a   : > { %1585 = vmatpush3.msra.mxu1 %v1509_v35  ;;  %1574 = vmatpush3.msra.mxu0 %v668_v36  ;;  %v1512_v42 = vld [vmem:[%s1949_s26 + $0x1] ss:$0 sm:$0xff]  ;;  %v1505_v44 = vld [vmem:[%s1949_s26] ss:$0 sm:$0xff]  ;;  %v1519_v62 = vld [vmem:[%s1949_s26 + $0x2] ss:$0 sm:$0xff] }
 0x17b   : > { %1586 = vmatprep.subr.mxu1 %v1781_v34  ;;  %1575 = vmatprep.subr.mxu0 %v1781_v34  ;;  %v1514_v53 = vld [vmem:[%s1947_s30 + $0x40] sm:$0xff]  ;;  %v1078_v8 = vld [vmem:[#allocation3] sm:$0xff] }
 0x17c   : > { %1587 = vmatpush3.msra.mxu1 %v1508_v37  ;;  %1576 = vmatpush3.msra.mxu0 %v667_v38  ;;  %v665_v40 = vld [vmem:[#allocation2] sm:$0xff] }
 0x17d   : > { %1588 = vmatprep.subr.mxu1 %v1781_v34  ;;  %1590 = vmatprep.mubr.msk.f32.mxu1 %vm1782_vm2, %v1781_v34 }
 0x17e   : > { %1589 = vmatpush3.msra.mxu1 %v1507_v39  ;;  %1577 = vmatprep.subr.mxu0 %v1781_v34 }
 0x17f   : > { %1591 = vmatmul.mubr.msk.f32.vlgmr.msra.gmra.mxu1 %vm677_vm1, %v665_v40  ;;  %1578 = vmatpush3.msra.mxu0 %v666_v41 }
 0x180   : > { %1579 = vmatprep.mubr.msk.f32.mxu0 %vm1782_vm2, %v1781_v34  ;;  %1604 = vmatprep.subr.mxu1 %v1781_v34 }
 0x181   : > { %1580 = vmatmul.mubr.msk.f32.vlgmr.msra.gmra.mxu0 %vm677_vm1, %v665_v40  ;;  %1606 = vmatprep.mubr.msk.f32.mxu1 %vm1782_vm2, %v1781_v34 }
 0x182   : > { %1593 = vmatprep.subr.mxu0 %v1781_v34  ;;  %1601 = vmatprep.mubr.msk.f32.mxu0 %vm1782_vm2, %v1781_v34 }
 0x183   : > { %1594 = vmatpush3.msra.mxu0 %v1517_v50 }
 0x184   : > { %1595 = vmatprep.subr.mxu0 %v1781_v34 }
 0x185   : > { %1596 = vmatpush3.msra.mxu0 %v1516_v51 }
 0x186   : > { %1597 = vmatprep.subr.mxu0 %v1781_v34 }
 0x187   : > { %1598 = vmatpush3.msra.mxu0 %v1515_v52 }
 0x188   : > { %1599 = vmatprep.subr.mxu0 %v1781_v34 }
 0x189   : > { %1600 = vmatpush3.msra.mxu0 %v1514_v53 }
 0x18a   : > { %1602 = vmatmul.mubr.msk.f32.vlgmr.msra.gmra.mxu0 %vm677_vm1, %v665_v40  ;;  %1614 = vmatprep.subr.mxu0 %v1781_v34 }
 0x18b   : > { %1616 = vmatprep.mubr.msk.f32.mxu0 %vm1782_vm2, %v1781_v34  ;;  %1615 = vmatpush3.msra.mxu0 %v1079_v2 }
 0x23f   : > { %v830_v43 = vpop.f32.mrf.mxu1 }
 0x240   : > { %v831_v45 = vadd.f32 %v1512_v42, %v830_v43 }
 0x241   : > { %v747_v46 = vpop.f32.mrf.mxu0  ;;  %v1592_v47 = vpop.f32.mrf.mxu1 }
 0x242   : > { %v748_v48 = vadd.f32 %v1505_v44, %v747_v46  ;;  %1605 = vmatpush3.xpose.msk.msra.mxu1 %vm917_vm3, %v831_v45 }
 0x243   : > { %v1581_v49 = vpop.f32.mrf.mxu0  ;;  %1609 = vmatprep.subr.mxu1 %v1781_v34 }
 0x245   : > { %1607 = vmatmul.mubr.msk.f32.vlgmr.msra.gmra.mxu1 %vm917_vm3, %v748_v48 }
 0x246   : > { %1611 = vmatprep.mubr.msk.f32.mxu1 %vm1782_vm2, %v1781_v34 }
 0x24a   : > { %v913_v63 = vpop.f32.mrf.mxu0 }
 0x24b   : > { %v914_v0 = vadd.f32 %v1519_v62, %v913_v63 }
 0x24c   : > { %v1603_v1 = vpop.f32.mrf.mxu0 }
 0x24d   : > { %1610 = vmatpush3.msra.mxu1 %v914_v0 }
 0x305   : > { %v990_v54 = vpop.f32.mrf.mxu1 }
 0x306   : > { %v994_v55 = vsel %vm917_vm3, %v990_v54, -inf }
 0x307   : > { %995 = vmax.xlane.f32.xlu0 %v994_v55  ;;  %v1608_v56 = vpop.f32.mrf.mxu1 }
 0x390   : > { %v996_v57 = vpop.xlane.xlu0 %995 }
 0x391   : > { %v997_v58 = vsub.f32 %v990_v54, %v996_v57 }
 0x393   : > { %v998_v59 = vmul.f32 1.442695, %v997_v58 }
 0x395   : > { %1716 = vpow2.f32 %v998_v59 }
 0x3a2   : > { %v1717_v60 = vpop.eup %1716 }
 0x3a3   : > { %v1000_v61 = vsel %vm917_vm3, %v1717_v60, 0.0 }
 0x3a4   : > { %1001 = vadd.xlane.f32.xlu0 %v1000_v61 }
 0x42d   : > { %v1002_v3 = vpop.xlane.xlu0 %1001 }
 0x42e   : > { %1718 = vrcp.f32 %v1002_v3 }
 0x43b   : > { %v1719_v4 = vpop.eup %1718 }
 0x43c   : > { %v1004_v5 = vmul.f32 %v1719_v4, %v1717_v60 }
 0x43e   : > { %1612 = vmatmul.mubr.msk.f32.vlgmr.msra.gmra.mxu1 %vm917_vm3, %v1004_v5 }
 0x4fe   : > { %v1074_v6 = vpop.f32.mrf.mxu1 }
 0x4ff   : > { %1617 = vmatmul.mubr.msk.f32.vlgmr.msra.gmra.mxu0 %vm917_vm3, %v1074_v6 }
 0x500   : > { %v1613_v7 = vpop.f32.mrf.mxu1 }
 0x5be   : > { %1158 = sbr.rel (%p1525_p13) target bundleno = 2207 (0x89f), region = 152 }
 0x5bf   : > { %v1149_v9 = vpop.f32.mrf.mxu0 }
 0x5c0   : > { %v1153_v10 = vadd.f32 %v1149_v9, %v1078_v8 }
 0x5c1   : > { %v1618_v11 = vpop.f32.mrf.mxu0 }
 0x5c2   : > { %1154 = vst.msk [vmem:[#allocation3] sm:$0xff] %vm677_vm1, %v1153_v10 }
 0x5c3   : > { %v1159_v12 = vld [vmem:[%s1935_s23] sm:$0xff]  ;;  %v1203_v23 = vld [vmem:[%s2088_s9 + $0x18] sm:$0xff]  ;;  %v1783_v24 = vmov 0.0   ;;  %v1202_v25 = vld [vmem:[%s2088_s9 + $0x10] sm:$0xff]  ;;  %vm1784_vm4 = vmmov 0   ;;  %vm1297_vm5 = vcmask 523264  }
 0x5c4   : > { %v1526_v14 = vld [vmem:[%s2083_s4] ss:$0 sm:$0xff]  ;;  %1619 = vmatprep.subr.mxu0 %v1783_v24  ;;  %1627 = vmatprep.mubr.msk.f32.mxu0 %vm1784_vm4, %v1783_v24  ;;  %v1201_v26 = vld [vmem:[%s2088_s9 + $0x8] sm:$0xff]  ;;  %v1296_v37 = vld [vmem:[%s2090_s11 + $0x38] sm:$0xff] }
 0x5c5   : > { %1620 = vmatpush3.msra.mxu0 %v1203_v23  ;;  %1630 = vmatprep.subr.mxu1 %v1783_v24  ;;  %v1200_v27 = vld [vmem:[%s2088_s9] sm:$0xff]  ;;  %v1295_v38 = vld [vmem:[%s2090_s11 + $0x30] sm:$0xff]  ;;  %v1294_v39 = vld [vmem:[%s2090_s11 + $0x28] sm:$0xff] }
 0x5c6   : > { %1621 = vmatprep.subr.mxu0 %v1783_v24  ;;  %1646 = vmatprep.mubr.msk.f32.mxu1 %vm1784_vm4, %v1783_v24  ;;  %v1527_v32 = vld [vmem:[%s2086_s7] ss:$0 sm:$0xff]  ;;  %v1292_v41 = vld [vmem:[%s2090_s11 + $0x18] sm:$0xff]  ;;  %v1291_v42 = vld [vmem:[%s2090_s11 + $0x10] sm:$0xff] }
 0x5c7   : > { %1622 = vmatpush3.msra.mxu0 %v1202_v25  ;;  %v1528_v34 = vld [vmem:[%s2087_s8] ss:$0 sm:$0xff]  ;;  %1631 = vmatpush3.msra.mxu1 %v1296_v37  ;;  %v1290_v43 = vld [vmem:[%s2090_s11 + $0x8] sm:$0xff] }
 0x5c8   : > { %1623 = vmatprep.subr.mxu0 %v1783_v24  ;;  %1632 = vmatprep.subr.mxu1 %v1783_v24  ;;  %v1293_v40 = vld [vmem:[%s2090_s11 + $0x20] sm:$0xff] }
 0x5c9   : > { %v1160_v13 = vld [vmem:[#allocation3] sm:$0xff]  ;;  %1624 = vmatpush3.msra.mxu0 %v1201_v26  ;;  %1633 = vmatpush3.msra.mxu1 %v1295_v38  ;;  %v1289_v44 = vld [vmem:[%s2090_s11] sm:$0xff] }
 0x5ca   : > { %v1161_v15 = vadd.f32 %v1160_v13, %v1159_v12  ;;  %1625 = vmatprep.subr.mxu0 %v1783_v24  ;;  %1634 = vmatprep.subr.mxu1 %v1783_v24  ;;  %v1529_v45 = vld [vmem:[%s2089_s10] ss:$0 sm:$0xff] }
 0x5cb   : > { %1626 = vmatpush3.msra.mxu0 %v1200_v27  ;;  %1635 = vmatpush3.msra.mxu1 %v1294_v39  ;;  %v1532_v55 = vld [vmem:[%s2091_s12] ss:$0 sm:$0xff] }
 0x5cc   : > { %v2000_v16 = vadd.f32 %v1526_v14, %v1161_v15  ;;  %1636 = vmatprep.subr.mxu1 %v1783_v24 }
 0x5cd   : > { %1637 = vmatpush3.msra.mxu1 %v1293_v40 }
 0x5ce   : > { %v1172_v17 = vsel %vm677_vm1, %v2000_v16, 0.0  ;;  %1638 = vmatprep.subr.mxu1 %v1783_v24 }
 0x5cf   : > { %1173 = vadd.xlane.f32.xlu0 %v1172_v17  ;;  %1639 = vmatpush3.msra.mxu1 %v1292_v41 }
 0x5d0   : > { %1640 = vmatprep.subr.mxu1 %v1783_v24 }
 0x5d1   : > { %1641 = vmatpush3.msra.mxu1 %v1291_v42 }
 0x5d2   : > { %1642 = vmatprep.subr.mxu1 %v1783_v24 }
 0x5d3   : > { %1643 = vmatpush3.msra.mxu1 %v1290_v43 }
 0x5d4   : > { %1644 = vmatprep.subr.mxu1 %v1783_v24 }
 0x5d5   : > { %1645 = vmatpush3.msra.mxu1 %v1289_v44 }
 0x658   : > { %v1174_v18 = vpop.xlane.xlu0 %1173 }
 0x659   : > { %v1176_v19 = vmul.f32 0.03125, %v1174_v18 }
 0x65b   : > { %v1177_v20 = vsub.f32 %v2000_v16, %v1176_v19 }
 0x65d   : > { %v1178_v21 = vmul.f32 %v1177_v20, %v1177_v20 }
 0x65f   : > { %v1179_v22 = vsel %vm677_vm1, %v1178_v21, 0.0 }
 0x660   : > { %1180 = vadd.xlane.f32.xlu0 %v1179_v22 }
 0x6e9   : > { %v1181_v28 = vpop.xlane.xlu0 %1180 }
 0x6ea   : > { %v1182_v29 = vmul.f32 0.03125, %v1181_v28 }
 0x6ec   : > { %v1183_v30 = vadd.f32 1e-05, %v1182_v29 }
 0x6ee   : > { %1720 = vrsqrt.f32 %v1183_v30 }
 0x6fb   : > { %v1721_v31 = vpop.eup %1720 }
 0x6fc   : > { %v1185_v33 = vmul.f32 %v1721_v31, %v1177_v20 }
 0x6fe   : > { %v1192_v35 = vmul.f32 %v1527_v32, %v1185_v33 }
 0x700   : > { %v1199_v36 = vadd.f32 %v1528_v34, %v1192_v35 }
 0x702   : > { %1628 = vmatmul.mubr.msk.f32.vlgmr.msra.gmra.mxu0 %vm677_vm1, %v1199_v36 }
 0x7c2   : > { %v1280_v46 = vpop.f32.mrf.mxu0 }
 0x7c3   : > { %v1281_v47 = vadd.f32 %v1529_v45, %v1280_v46 }
 0x7c4   : > { %v1629_v48 = vpop.f32.mrf.mxu0 }
 0x7c5   : > { %v1285_v49 = vmul.f32 0.70710677, %v1281_v47  ;;  %v1284_v51 = vmul.f32 0.5, %v1281_v47 }
 0x7c7   : > { %1722 = verf.f32 %v1285_v49 }
 0x7d4   : > { %v1723_v50 = vpop.eup %1722 }
 0x7d5   : > { %v1287_v52 = vadd.f32 1.0, %v1723_v50 }
 0x7d7   : > { %v1288_v53 = vmul.f32 %v1287_v52, %v1284_v51 }
 0x7d9   : > { %1647 = vmatmul.mubr.msk.f32.vlgmr.msra.gmra.mxu1 %vm1297_vm5, %v1288_v53 }
 0x899   : > { %v1367_v54 = vpop.f32.mrf.mxu1 }
 0x89a   : > { %v1371_v56 = vadd.f32 %v1367_v54, %v2000_v16 }
 0x89b   : > { %v1648_v57 = vpop.f32.mrf.mxu1 }
 0x89c   : > { %v1379_v58 = vadd.f32 %v1532_v55, %v1371_v56 }
 0x89e   : > { %1380 = vst.msk [vmem:[%s1945_s20] sm:$0xff] %vm677_vm1, %v1379_v58 }
 0x89f PF: > { %s23_s14 = sadd.s32 1, %s1778_s14   ;;  %s2108_s25 = sld [smem:[#allocation6_spill]] }
 0x8a0   : > { %p20_p0 = scmp.ge.s32.totalorder %s23_s14, 10   ;;  %s2109_s26 = sld [smem:[#allocation11_spill]] }
 0x8a1   : > { %s2110_s27 = sld [smem:[#allocation7_spill]] }
 0x8a2   : > { %s2111_s28 = sld [smem:[#allocation8_spill]]  ;;  %22 = sbr.rel (!%p20_p0) target bundleno = 7 (0x7), region = 205 }
 0x8a3   : > { %s2112_s29 = sld [smem:[#allocation9_spill]] }
 0x8a4   : > { %s2113_s30 = sld [smem:[#allocation10_spill]] }

// kernel: transformer_encoder.3
= control target key start
LH: loop header
LB: loop body
LE: loop exit
PB: predicated region body
PF: predicated region fallthrough
CT: control target
= control target key end

     0   :  { %s2257_s0 = inlined_call_operand.vmem [shape: f32[2,8,32], index: 0, kind: input, shape index: {}]   ;;  %s2258_s1 = inlined_call_operand.vmem [shape: f32[3,4,32,8], index: 1, kind: input, shape index: {}]   ;;  %s2259_s2 = inlined_call_operand.vmem [shape: f32[3,4,1,8], index: 2, kind: input, shape index: {}]   ;;  %s2260_s3 = inlined_call_operand.vmem [shape: f32[4,8,32], index: 3, kind: input, shape index: {}]   ;;  %s2261_s4 = inlined_call_operand.vmem [shape: f32[1,32], index: 4, kind: input, shape index: {}]   ;;  %s2262_s5 = inlined_call_operand.vmem [shape: f32[1,32], index: 5, kind: input, shape index: {}]   ;;  %s2263_s6 = inlined_call_operand.vmem [shape: f32[1,32], index: 6, kind: input, shape index: {}]   ;;  %s2264_s7 = inlined_call_operand.vmem [shape: f32[1,32], index: 7, kind: input, shape index: {}]   ;;  %s2265_s8 = inlined_call_operand.vmem [shape: f32[1,32], index: 8, kind: input, shape index: {}]   ;;  %s2266_s9 = inlined_call_operand.vmem [shape: f32[32,64], index: 9, kind: input, shape index: {}]   ;;  %s2267_s10 = inlined_call_operand.vmem [shape: f32[1,64], index: 10, kind: input, shape index: {}]   ;;  %s2268_s11 = inlined_call_operand.vmem [shape: f32[64,32], index: 11, kind: input, shape index: {}]   ;;  %s2269_s12 = inlined_call_operand.vmem [shape: f32[1,32], index: 12, kind: input, shape index: {}]   ;;  %s2270_s13 = inlined_call_operand.hbm [shape: f32[2,8,32], index: 13, kind: output, shape index: {}]  }
   0x1   :  { %2280 = sst [smem:[#allocation17_spill]] %s2258_s1 }
   0x2   :  { %2281 = sst [smem:[#allocation18_spill]] %s2259_s2 }
   0x3   :  { %2282 = sst [smem:[#allocation19_spill]] %s2267_s10 }
   0x4   :  { %2283 = sst [smem:[#allocation20_spill]] %s2268_s11 }
   0x5   :  { %2284 = sst [smem:[#allocation21_spill]] %s2269_s12 }
   0x6   :  { %2285 = sst [smem:[#allocation22_spill]] %s2270_s13 }
   0x7   :  { %18 = vsyncpa [#allocation7], 0 }
   0x8   :  { %20 = vsyncpa [#allocation7 + $0x1], 0  ;;  %s1963_s25 = smov 0   ;;  %s1965_s26 = smov 0  }
   0x9   :  { %s1967_s27 = smov 0   ;;  %s1969_s28 = smov 0  }
   0xa   :  { %s1971_s29 = smov 0   ;;  %s1973_s30 = smov 0  }
   0xb   :  { %s1975_s14 = smov 0   ;;  %s1977_s15 = smov 0  }
   0xc   :  { %s1979_s16 = smov 0   ;;  %s1981_s17 = smov 0  }
   0xd LB: > { %2286 = sst [smem:[#allocation9_spill]] %s1857_s27  ;;  %s1512_s18 = sadd.s32 4294967295, %s1885_s17   ;;  %s1885_s17 = sphi %s1981_s17, %s26_s17   ;;  %s1881_s16 = sphi %s1979_s16, %s2311_s16   ;;  %s1877_s15 = sphi %s1977_s15, %s2310_s15   ;;  %s1873_s14 = sphi %s1975_s14, %s2309_s14   ;;  %s1869_s30 = sphi %s1973_s30, %s2308_s30   ;;  %s1865_s29 = sphi %s1971_s29, %s2307_s29   ;;  %s1861_s28 = sphi %s1969_s28, %s2306_s28   ;;  %s1857_s27 = sphi %s1967_s27, %s2305_s27   ;;  %s1853_s26 = sphi %s1965_s26, %s2313_s26   ;;  %s1849_s25 = sphi %s1963_s25, %s2312_s25  }
   0xe   : > { %2287 = sst [smem:[#allocation10_spill]] %s1865_s29  ;;  %s1513_s19 = sadd.s32 4294967294, %s1885_s17  }
   0xf   : > { %2288 = sst [smem:[#allocation11_spill]] %s1877_s15  ;;  %s35_s20 = sadd.s32 1, %s1877_s15 }
  0x10   : > { %2289 = sst [smem:[#allocation12_spill]] %s1881_s16  ;;  %s38_s21 = sadd.s32 1, %s1881_s16 }
  0x11   : > { %p36_p0 = scmp.ge.s32.totalorder %s35_s20, 4  ;;  %s71_s22 = sadd.s32 1, %s1865_s29 }
  0x12   : > { %p78_p1 = scmp.ne.s32.totalorder %s1865_s29, %s1861_s28  ;;  %p79_p2 = scmp.eq.s32.totalorder %s1885_s17, 0 }
  0x13   : > { %s2315_s20 = smov (%p36_p0, %s35_s20), 0  ;;  %s2317_s21 = smov (!%p36_p0, %s38_s21), %s1881_s16 }
  0x14   : > { %2290 = sst [smem:[#allocation13_spill]] %s2315_s20  ;;  %s68_s23 = ssub.s32 %s1877_s15, %s2315_s20 }
  0x15   : > { %p2026_p3 = por %p79_p2, %p78_p1  ;;  %p40_p4 = scmp.ge.s32.totalorder %s2317_s21, 2 }
  0x16   : > { %p69_p5 = scmp.eq.s32.totalorder %s68_s23, 0  ;;  %s338_s13 = sadd.s32 1, %s1857_s27 }
  0x17   : > { %p348_p6 = scmp.ne.s32.totalorder %s1857_s27, %s1853_s26  ;;  %s2319_s21 = smov (%p40_p4, %s2317_s21), 0 }
  0x18   : > { %2292 = sst [smem:[#allocation14_spill]] %s2319_s21  ;;  %s335_s10 = ssub.s32 %s1881_s16, %s2319_s21 }
  0x19   : > { %s2036_s12 = scalar_select %p69_p5, %s1865_s29, %s71_s22  }
  0x1a   : > { %p349_p7 = scmp.eq.s32.totalorder %s1512_s18, 7  ;;  %p336_p8 = scmp.eq.s32.totalorder %s335_s10, 0 }
  0x1b   : > { %2293 = sst [smem:[#allocation15_spill]] %s2036_s12  ;;  %p354_p9 = scmp.ne.s32.totalorder %s1853_s26, %s1849_s25 }
  0x1c   : > { %p2042_p10 = por %p349_p7, %p348_p6  ;;  %p355_p11 = scmp.eq.s32.totalorder %s1513_s19, 7 }
  0x1d   : > { %s2047_s20 = scalar_select %p336_p8, %s1857_s27, %s338_s13  }
  0x1e   : > { %p2049_p12 = por %p355_p11, %p354_p9  ;;  %p1515_p13 = scmp.ge.s32.totalorder %s1885_s17, 8 }
  0x1f   : > { %2295 = sst [smem:[#allocation16_spill]] %s2047_s20 }
  0x20   : > { %398 = sbr.rel (%p1515_p13) target bundleno = 65 (0x41), region = 52 }
  0x25   : > { %408 = sbr.rel (!%p2026_p3) target bundleno = 54 (0x36), region = 60  ;;  %s410_s10 = sand.u32 (%p2026_p3), 1, %s1865_s29  }
  0x26   : > { %s1557_s18 = sshll.u32 (%p2026_p3), %s1877_s15, 5  ;;  %s1671_s22 = smul.u32 (%p2026_p3), 96, %s410_s10 }
  0x27   : > { %s2297_s1 = sld [smem:[#allocation17_spill]] (%p2026_p3) }
  0x28   : > { %s412_s19 = scalar_lea.vmem (%p2026_p3), [#allocation4], %s1671_s22 }
  0x2d   : > { %s415_s13 = scalar_lea.vmem %s2297_s1, %s1557_s18 }
  0x2e   : > { %v466_v0 = vld [vmem:[%s415_s13] sm:$0xff]  ;;  %v468_v1 = vld [vmem:[%s415_s13 + $0x8] sm:$0xff]  ;;  %v470_v2 = vld [vmem:[%s415_s13 + $0x10] sm:$0xff] }
  0x2f   : > { %v472_v3 = vld [vmem:[%s415_s13 + $0x18] sm:$0xff]  ;;  %v474_v4 = vld [vmem:[%s415_s13 + $0x80] sm:$0xff]  ;;  %v476_v5 = vld [vmem:[%s415_s13 + $0x88] sm:$0xff]  ;;  %467 = vst [vmem:[%s412_s19] sm:$0xff] %v466_v0 }
  0x30   : > { %469 = vst [vmem:[%s412_s19 + $0x8] sm:$0xff] %v468_v1  ;;  %471 = vst [vmem:[%s412_s19 + $0x10] sm:$0xff] %v470_v2  ;;  %v478_v6 = vld [vmem:[%s415_s13 + $0x90] sm:$0xff]  ;;  %v480_v7 = vld [vmem:[%s415_s13 + $0x98] sm:$0xff] }
  0x31   : > { %473 = vst [vmem:[%s412_s19 + $0x18] sm:$0xff] %v472_v3  ;;  %475 = vst [vmem:[%s412_s19 + $0x20] sm:$0xff] %v474_v4  ;;  %v482_v8 = vld [vmem:[%s415_s13 + $0x100] sm:$0xff]  ;;  %v484_v9 = vld [vmem:[%s415_s13 + $0x108] sm:$0xff] }
  0x32   : > { %477 = vst [vmem:[%s412_s19 + $0x28] sm:$0xff] %v476_v5  ;;  %479 = vst [vmem:[%s412_s19 + $0x30] sm:$0xff] %v478_v6  ;;  %v486_v10 = vld [vmem:[%s415_s13 + $0x110] sm:$0xff]  ;;  %v488_v11 = vld [vmem:[%s415_s13 + $0x118] sm:$0xff] }
  0x33   : > { %481 = vst [vmem:[%s412_s19 + $0x38] sm:$0xff] %v480_v7  ;;  %483 = vst [vmem:[%s412_s19 + $0x40] sm:$0xff] %v482_v8 }
  0x34   : > { %485 = vst [vmem:[%s412_s19 + $0x48] sm:$0xff] %v484_v9  ;;  %487 = vst [vmem:[%s412_s19 + $0x50] sm:$0xff] %v486_v10 }
  0x35   : > { %489 = vst [vmem:[%s412_s19 + $0x58] sm:$0xff] %v488_v11 }
  0x36 PF: > { %495 = sbr.rel (!%p2026_p3) target bundleno = 65 (0x41), region = 98  ;;  %s497_s16 = sand.u32 (%p2026_p3), 1, %s1865_s29  }
  0x37   : > { %s2298_s2 = sld [smem:[#allocation18_spill]] (%p2026_p3)  ;;  %s1672_s22 = smul.u32 (%p2026_p3), 3, %s497_s16 }
  0x39   : > { %s499_s1 = scalar_lea.vmem (%p2026_p3), [#allocation5], %s1672_s22 }
  0x3d   : > { %s500_s18 = scalar_lea.vmem %s2298_s2, %s1877_s15 }
  0x3e   : > { %v517_v12 = vld [vmem:[%s500_s18] sm:$0x1]  ;;  %v519_v13 = vld [vmem:[%s500_s18 + $0x4] sm:$0x1]  ;;  %v521_v14 = vld [vmem:[%s500_s18 + $0x8] sm:$0x1] }
  0x3f   : > { %518 = vst [vmem:[%s499_s1] sm:$0x1] %v517_v12  ;;  %520 = vst [vmem:[%s499_s1 + $0x1] sm:$0x1] %v519_v13 }
  0x40   : > { %522 = vst [vmem:[%s499_s1 + $0x2] sm:$0x1] %v521_v14 }
  0x41 PF: > { %p1518_p0 = scmp.ge.s32.totalorder %s1885_s17, 1  ;;  %p550_p1 = scmp.lt.s32.totalorder %s1885_s17, 9 }
  0x43   : > { %p551_p2 = pnand %p1518_p0, %p550_p1 }
  0x44   : > { %s557_s24 = sand.u32 (!%p551_p2), 1, %s1861_s28   ;;  %s2278_s13 = sand.u32 (!%p551_p2), 1, %s1853_s26  }
  0x45   : > { %554 = sbr.rel (%p551_p2) target bundleno = 2249 (0x8c9), region = 136  ;;  %s2074_s1 = sshll.u32 (!%p551_p2), %s2278_s13, 3 }
  0x46   : > { %s1673_s19 = smul.u32 (!%p551_p2), 96, %s557_s24  ;;  %p619_p3 = scmp.lt.s32.totalorder (!%p551_p2), %s1873_s14, 1 }
  0x47   : > { %s1674_s16 = smul.u32 (!%p551_p2), 3, %s557_s24  ;;  %p623_p4 = scmp.lt.s32.totalorder (!%p551_p2), %s1869_s30, 3 }
  0x48   : > { %s2090_s13 = scalar_lea.vmem (!%p551_p2), [#allocation4], %s1673_s19  ;;  %s618_s24 = scalar_lea.vmem (!%p551_p2), [#allocation6], %s2074_s1 }
  0x49   : > { %s2092_s27 = scalar_lea.vmem (!%p551_p2), [#allocation5], %s1674_s16  ;;  %p1522_p5 = scmp.ne.s32.totalorder (!%p551_p2), %s1869_s30, 0 }
  0x4a   : > { %s620_s21 = scalar_select %p619_p3, %s1873_s14, 1 }
  0x4b   : > { %s624_s10 = scalar_select %p623_p4, %s1869_s30, 3 }
  0x4c   : > { %s1520_s18 = sshll.u32 %s620_s21, 3  ;;  %630 = sbr.rel (%p1522_p5) target bundleno = 391 (0x187), region = 148 }
  0x4d   : > { %s2083_s15 = scalar_lea.vmem %s2257_s0, %s1520_s18  ;;  %s1521_s12 = sshll.u32 %s624_s10, 3 }
  0x4e   : > { %s2088_s20 = scalar_lea.vmem %s2260_s3, %s1521_s12 }
  0x51   : > { %v631_v15 = vld [vmem:[%s2083_s15] sm:$0xff]  ;;  %vm634_vm0 = vcmask 261120   ;;  %v1887_v17 = vmov 0.0  }
  0x52   : > { %v635_v16 = vsel %vm634_vm0, %v631_v15, 0.0  ;;  %664 = vst.msk [vmem:[#allocation3] sm:$0xff] %vm634_vm0, %v1887_v17  ;;  %v1523_v27 = vld [vmem:[%s2262_s5] ss:$0 sm:$0xff] }
  0x53   : > { %636 = vadd.xlane.f32.xlu0 %v635_v16  ;;  %v1524_v29 = vld [vmem:[%s2263_s6] ss:$0 sm:$0xff] }
  0xdc   : > { %v637_v18 = vpop.xlane.xlu0 %636 }
  0xdd   : > { %v639_v19 = vmul.f32 0.03125, %v637_v18 }
  0xdf   : > { %v640_v20 = vsub.f32 %v631_v15, %v639_v19 }
  0xe1   : > { %v641_v21 = vmul.f32 %v640_v20, %v640_v20 }
  0xe3   : > { %v642_v22 = vsel %vm634_vm0, %v641_v21, 0.0 }
  0xe4   : > { %643 = vadd.xlane.f32.xlu0 %v642_v22 }
 0x16d   : > { %v644_v23 = vpop.xlane.xlu0 %643 }
 0x16e   : > { %v645_v24 = vmul.f32 0.03125, %v644_v23 }
 0x170   : > { %v646_v25 = vadd.f32 1e-05, %v645_v24 }
 0x172   : > { %1767 = vrsqrt.f32 %v646_v25 }
 0x17f   : > { %v1768_v26 = vpop.eup %1767 }
 0x180   : > { %v648_v28 = vmul.f32 %v1768_v26, %v640_v20 }
 0x182   : > { %v655_v30 = vmul.f32 %v1523_v27, %v648_v28 }
 0x184   : > { %v662_v31 = vadd.f32 %v1524_v29, %v655_v30 }
 0x186   : > { %663 = vst.msk [vmem:[#allocation2] sm:$0xff] %vm634_vm0, %v662_v31 }
 0x187 PF: > { %v1530_v32 = vld [vmem:[%s2090_s13 + $0x38] sm:$0xff]  ;;  %v1888_v34 = vmov 0.0   ;;  %v1529_v35 = vld [vmem:[%s2090_s13 + $0x30] sm:$0xff]  ;;  %v1528_v37 = vld [vmem:[%s2090_s13 + $0x28] sm:$0xff]  ;;  %vm677_vm1 = vcmask 261120   ;;  %vm1889_vm2 = vmmov 0  }
 0x188   : > { %v669_v33 = vld [vmem:[%s2090_s13 + $0x18] sm:$0xff]  ;;  %1604 = vmatprep.subr.mxu1 %v1888_v34  ;;  %1593 = vmatprep.subr.mxu0 %v1888_v34  ;;  %v668_v36 = vld [vmem:[%s2090_s13 + $0x10] sm:$0xff]  ;;  %v667_v38 = vld [vmem:[%s2090_s13 + $0x8] sm:$0xff]  ;;  %vm917_vm3 = vcmask 64512   ;;  %p1545_p6 = scmp.ne.s32.totalorder %s1869_s30, 3 }
 0x189   : > { %1605 = vmatpush3.msra.mxu1 %v1530_v32  ;;  %1594 = vmatpush3.msra.mxu0 %v669_v33  ;;  %v1527_v39 = vld [vmem:[%s2090_s13 + $0x20] sm:$0xff]  ;;  %v1537_v50 = vld [vmem:[%s2090_s13 + $0x58] sm:$0xff]  ;;  %v1536_v51 = vld [vmem:[%s2090_s13 + $0x50] sm:$0xff]  ;;  %s2301_s10 = sld [smem:[#allocation21_spill]] (!%p1545_p6) }
 0x18a   : > { %1606 = vmatprep.subr.mxu1 %v1888_v34  ;;  %1595 = vmatprep.subr.mxu0 %v1888_v34  ;;  %v666_v41 = vld [vmem:[%s2090_s13] sm:$0xff]  ;;  %v1535_v52 = vld [vmem:[%s2090_s13 + $0x48] sm:$0xff]  ;;  %v1079_v2 = vld [vmem:[%s2088_s20] sm:$0xff]  ;;  %s2299_s20 = sld [smem:[#allocation20_spill]] (!%p1545_p6) }
 0x18b   : > { %1607 = vmatpush3.msra.mxu1 %v1529_v35  ;;  %1596 = vmatpush3.msra.mxu0 %v668_v36  ;;  %v1532_v42 = vld [vmem:[%s2092_s27 + $0x1] ss:$0 sm:$0xff]  ;;  %v1525_v44 = vld [vmem:[%s2092_s27] ss:$0 sm:$0xff]  ;;  %v1539_v62 = vld [vmem:[%s2092_s27 + $0x2] ss:$0 sm:$0xff] }
 0x18c   : > { %1608 = vmatprep.subr.mxu1 %v1888_v34  ;;  %1597 = vmatprep.subr.mxu0 %v1888_v34  ;;  %v1534_v53 = vld [vmem:[%s2090_s13 + $0x40] sm:$0xff]  ;;  %v1078_v8 = vld [vmem:[#allocation3] sm:$0xff]  ;;  %s2300_s13 = sld [smem:[#allocation19_spill]] (!%p1545_p6) }
 0x18d   : > { %1609 = vmatpush3.msra.mxu1 %v1528_v37  ;;  %1598 = vmatpush3.msra.mxu0 %v667_v38  ;;  %v665_v40 = vld [vmem:[#allocation2] sm:$0xff] }
 0x18e   : > { %1610 = vmatprep.subr.mxu1 %v1888_v34  ;;  %1612 = vmatprep.mubr.msk.f32.mxu1 %vm1889_vm2, %v1888_v34 }
 0x18f   : > { %1611 = vmatpush3.msra.mxu1 %v1527_v39  ;;  %1599 = vmatprep.subr.mxu0 %v1888_v34 }
 0x190   : > { %1613 = vmatmul.mubr.msk.f32.vlgmr.msra.gmra.mxu1 %vm677_vm1, %v665_v40  ;;  %1600 = vmatpush3.msra.mxu0 %v666_v41 }
 0x191   : > { %1601 = vmatprep.mubr.msk.f32.mxu0 %vm1889_vm2, %v1888_v34  ;;  %1626 = vmatprep.subr.mxu1 %v1888_v34 }
 0x192   : > { %1602 = vmatmul.mubr.msk.f32.vlgmr.msra.gmra.mxu0 %vm677_vm1, %v665_v40  ;;  %1628 = vmatprep.mubr.msk.f32.mxu1 %vm1889_vm2, %v1888_v34 }
 0x193   : > { %1615 = vmatprep.subr.mxu0 %v1888_v34  ;;  %1623 = vmatprep.mubr.msk.f32.mxu0 %vm1889_vm2, %v1888_v34 }
 0x194   : > { %1616 = vmatpush3.msra.mxu0 %v1537_v50 }
 0x195   : > { %1617 = vmatprep.subr.mxu0 %v1888_v34 }
 0x196   : > { %1618 = vmatpush3.msra.mxu0 %v1536_v51 }
 0x197   : > { %1619 = vmatprep.subr.mxu0 %v1888_v34 }
 0x198   : > { %1620 = vmatpush3.msra.mxu0 %v1535_v52 }
 0x199   : > { %1621 = vmatprep.subr.mxu0 %v1888_v34 }
 0x19a   : > { %1622 = vmatpush3.msra.mxu0 %v1534_v53 }
 0x19b   : > { %1624 = vmatmul.mubr.msk.f32.vlgmr.msra.gmra.mxu0 %vm677_vm1, %v665_v40  ;;  %1636 = vmatprep.subr.mxu0 %v1888_v34 }
 0x19c   : > { %1638 = vmatprep.mubr.msk.f32.mxu0 %vm1889_vm2, %v1888_v34  ;;  %1637 = vmatpush3.msra.mxu0 %v1079_v2 }
 0x250   : > { %v830_v43 = vpop.f32.mrf.mxu1 }
 0x251   : > { %v831_v45 = vadd.f32 %v1532_v42, %v830_v43 }
 0x252   : > { %v747_v46 = vpop.f32.mrf.mxu0  ;;  %v1614_v47 = vpop.f32.mrf.mxu1 }
 0x253   : > { %v748_v48 = vadd.f32 %v1525_v44, %v747_v46  ;;  %1627 = vmatpush3.xpose.msk.msra.mxu1 %vm917_vm3, %v831_v45 }
 0x254   : > { %v1603_v49 = vpop.f32.mrf.mxu0  ;;  %1631 = vmatprep.subr.mxu1 %v1888_v34 }
 0x256   : > { %1629 = vmatmul.mubr.msk.f32.vlgmr.msra.gmra.mxu1 %vm917_vm3, %v748_v48 }
 0x257   : > { %1633 = vmatprep.mubr.msk.f32.mxu1 %vm1889_vm2, %v1888_v34 }
 0x25b   : > { %v913_v63 = vpop.f32.mrf.mxu0 }
 0x25c   : > { %v914_v0 = vadd.f32 %v1539_v62, %v913_v63 }
 0x25d   : > { %v1625_v1 = vpop.f32.mrf.mxu0 }
 0x25e   : > { %1632 = vmatpush3.msra.mxu1 %v914_v0 }
 0x316   : > { %v990_v54 = vpop.f32.mrf.mxu1 }
 0x317   : > { %v994_v55 = vsel %vm917_vm3, %v990_v54, -inf }
 0x318   : > { %995 = vmax.xlane.f32.xlu0 %v994_v55  ;;  %v1630_v56 = vpop.f32.mrf.mxu1 }
 0x3a1   : > { %v996_v57 = vpop.xlane.xlu0 %995 }
 0x3a2   : > { %v997_v58 = vsub.f32 %v990_v54, %v996_v57 }
 0x3a4   : > { %v998_v59 = vmul.f32 1.442695, %v997_v58 }
 0x3a6   : > { %1769 = vpow2.f32 %v998_v59 }
 0x3b3   : > { %v1770_v60 = vpop.eup %1769 }
 0x3b4   : > { %v1000_v61 = vsel %vm917_vm3, %v1770_v60, 0.0 }
 0x3b5   : > { %1001 = vadd.xlane.f32.xlu0 %v1000_v61 }
 0x43e   : > { %v1002_v3 = vpop.xlane.xlu0 %1001 }
 0x43f   : > { %1771 = vrcp.f32 %v1002_v3 }
 0x44c   : > { %v1772_v4 = vpop.eup %1771 }
 0x44d   : > { %v1004_v5 = vmul.f32 %v1772_v4, %v1770_v60 }
 0x44f   : > { %1634 = vmatmul.mubr.msk.f32.vlgmr.msra.gmra.mxu1 %vm917_vm3, %v1004_v5 }
 0x50f   : > { %v1074_v6 = vpop.f32.mrf.mxu1 }
 0x510   : > { %1639 = vmatmul.mubr.msk.f32.vlgmr.msra.gmra.mxu0 %vm917_vm3, %v1074_v6 }
 0x511   : > { %v1635_v7 = vpop.f32.mrf.mxu1 }
 0x5cf   : > { %1158 = sbr.rel (%p1545_p6) target bundleno = 2224 (0x8b0), region = 152 }
 0x5d0   : > { %v1149_v9 = vpop.f32.mrf.mxu0 }
 0x5d1   : > { %v1153_v10 = vadd.f32 %v1149_v9, %v1078_v8 }
 0x5d2   : > { %v1640_v11 = vpop.f32.mrf.mxu0 }
 0x5d3   : > { %1154 = vst.msk [vmem:[#allocation3] sm:$0xff] %vm677_vm1, %v1153_v10 }
 0x5d4   : > { %v1159_v12 = vld [vmem:[%s2083_s15] sm:$0xff]  ;;  %v1203_v23 = vld [vmem:[%s2266_s9 + $0x18] sm:$0xff]  ;;  %v1890_v24 = vmov 0.0   ;;  %v1202_v25 = vld [vmem:[%s2266_s9 + $0x10] sm:$0xff]  ;;  %vm1891_vm4 = vmmov 0   ;;  %vm1297_vm5 = vcmask 523264  }
 0x5d5   : > { %v1546_v14 = vld [vmem:[%s2261_s4] ss:$0 sm:$0xff]  ;;  %1641 = vmatprep.subr.mxu0 %v1890_v24  ;;  %1649 = vmatprep.mubr.msk.f32.mxu0 %vm1891_vm4, %v1890_v24  ;;  %v1201_v26 = vld [vmem:[%s2266_s9 + $0x8] sm:$0xff]  ;;  %v1296_v37 = vld [vmem:[%s2299_s20 + $0x38] sm:$0xff] }
 0x5d6   : > { %1642 = vmatpush3.msra.mxu0 %v1203_v23  ;;  %1652 = vmatprep.subr.mxu1 %v1890_v24  ;;  %v1200_v27 = vld [vmem:[%s2266_s9] sm:$0xff]  ;;  %v1295_v38 = vld [vmem:[%s2299_s20 + $0x30] sm:$0xff]  ;;  %v1294_v39 = vld [vmem:[%s2299_s20 + $0x28] sm:$0xff] }
 0x5d7   : > { %1643 = vmatprep.subr.mxu0 %v1890_v24  ;;  %1668 = vmatprep.mubr.msk.f32.mxu1 %vm1891_vm4, %v1890_v24  ;;  %v1547_v32 = vld [vmem:[%s2264_s7] ss:$0 sm:$0xff]  ;;  %v1292_v41 = vld [vmem:[%s2299_s20 + $0x18] sm:$0xff]  ;;  %v1291_v42 = vld [vmem:[%s2299_s20 + $0x10] sm:$0xff] }
 0x5d8   : > { %1644 = vmatpush3.msra.mxu0 %v1202_v25  ;;  %v1548_v34 = vld [vmem:[%s2265_s8] ss:$0 sm:$0xff]  ;;  %1653 = vmatpush3.msra.mxu1 %v1296_v37  ;;  %v1290_v43 = vld [vmem:[%s2299_s20 + $0x8] sm:$0xff] }
 0x5d9   : > { %1645 = vmatprep.subr.mxu0 %v1890_v24  ;;  %1654 = vmatprep.subr.mxu1 %v1890_v24  ;;  %v1293_v40 = vld [vmem:[%s2299_s20 + $0x20] sm:$0xff] }
 0x5da   : > { %v1160_v13 = vld [vmem:[#allocation3] sm:$0xff]  ;;  %1646 = vmatpush3.msra.mxu0 %v1201_v26  ;;  %1655 = vmatpush3.msra.mxu1 %v1295_v38  ;;  %v1289_v44 = vld [vmem:[%s2299_s20] sm:$0xff] }
 0x5db   : > { %v1161_v15 = vadd.f32 %v1160_v13, %v1159_v12  ;;  %1647 = vmatprep.subr.mxu0 %v1890_v24  ;;  %1656 = vmatprep.subr.mxu1 %v1890_v24  ;;  %v1549_v45 = vld [vmem:[%s2300_s13] ss:$0 sm:$0xff] }
 0x5dc   : > { %1648 = vmatpush3.msra.mxu0 %v1200_v27  ;;  %1657 = vmatpush3.msra.mxu1 %v1294_v39  ;;  %v1552_v55 = vld [vmem:[%s2301_s10] ss:$0 sm:$0xff] }
 0x5dd   : > { %v2144_v16 = vadd.f32 %v1546_v14, %v1161_v15  ;;  %1658 = vmatprep.subr.mxu1 %v1890_v24 }
 0x5de   : > { %1659 = vmatpush3.msra.mxu1 %v1293_v40 }
 0x5df   : > { %v1172_v17 = vsel %vm677_vm1, %v2144_v16, 0.0  ;;  %1660 = vmatprep.subr.mxu1 %v1890_v24 }
 0x5e0   : > { %1173 = vadd.xlane.f32.xlu0 %v1172_v17  ;;  %1661 = vmatpush3.msra.mxu1 %v1292_v41 }
 0x5e1   : > { %1662 = vmatprep.subr.mxu1 %v1890_v24 }
 0x5e2   : > { %1663 = vmatpush3.msra.mxu1 %v1291_v42 }
 0x5e3   : > { %1664 = vmatprep.subr.mxu1 %v1890_v24 }
 0x5e4   : > { %1665 = vmatpush3.msra.mxu1 %v1290_v43 }
 0x5e5   : > { %1666 = vmatprep.subr.mxu1 %v1890_v24 }
 0x5e6   : > { %1667 = vmatpush3.msra.mxu1 %v1289_v44 }
 0x669   : > { %v1174_v18 = vpop.xlane.xlu0 %1173 }
 0x66a   : > { %v1176_v19 = vmul.f32 0.03125, %v1174_v18 }
 0x66c   : > { %v1177_v20 = vsub.f32 %v2144_v16, %v1176_v19 }
 0x66e   : > { %v1178_v21 = vmul.f32 %v1177_v20, %v1177_v20 }
 0x670   : > { %v1179_v22 = vsel %vm677_vm1, %v1178_v21, 0.0 }
 0x671   : > { %1180 = vadd.xlane.f32.xlu0 %v1179_v22 }
 0x6fa   : > { %v1181_v28 = vpop.xlane.xlu0 %1180 }
 0x6fb   : > { %v1182_v29 = vmul.f32 0.03125, %v1181_v28 }
 0x6fd   : > { %v1183_v30 = vadd.f32 1e-05, %v1182_v29 }
 0x6ff   : > { %1773 = vrsqrt.f32 %v1183_v30 }
 0x70c   : > { %v1774_v31 = vpop.eup %1773 }
 0x70d   : > { %v1185_v33 = vmul.f32 %v1774_v31, %v1177_v20 }
 0x70f   : > { %v1192_v35 = vmul.f32 %v1547_v32, %v1185_v33 }
 0x711   : > { %v1199_v36 = vadd.f32 %v1548_v34, %v1192_v35 }
 0x713   : > { %1650 = vmatmul.mubr.msk.f32.vlgmr.msra.gmra.mxu0 %vm677_vm1, %v1199_v36 }
 0x7d3   : > { %v1280_v46 = vpop.f32.mrf.mxu0 }
 0x7d4   : > { %v1281_v47 = vadd.f32 %v1549_v45, %v1280_v46 }
 0x7d5   : > { %v1651_v48 = vpop.f32.mrf.mxu0 }
 0x7d6   : > { %v1285_v49 = vmul.f32 0.70710677, %v1281_v47  ;;  %v1284_v51 = vmul.f32 0.5, %v1281_v47 }
 0x7d8   : > { %1775 = verf.f32 %v1285_v49 }
 0x7e5   : > { %v1776_v50 = vpop.eup %1775 }
 0x7e6   : > { %v1287_v52 = vadd.f32 1.0, %v1776_v50 }
 0x7e8   : > { %v1288_v53 = vmul.f32 %v1287_v52, %v1284_v51 }
 0x7ea   : > { %1669 = vmatmul.mubr.msk.f32.vlgmr.msra.gmra.mxu1 %vm1297_vm5, %v1288_v53 }
 0x8aa   : > { %v1367_v54 = vpop.f32.mrf.mxu1 }
 0x8ab   : > { %v1371_v56 = vadd.f32 %v1367_v54, %v2144_v16 }
 0x8ac   : > { %v1670_v57 = vpop.f32.mrf.mxu1 }
 0x8ad   : > { %v1379_v58 = vadd.f32 %v1552_v55, %v1371_v56 }
 0x8af   : > { %1380 = vst.msk [vmem:[%s618_s24] sm:$0xff] %vm677_vm1, %v1379_v58 }
 0x8b0 PF: > { %s1554_s18 = sshll.u32 %s1873_s14, 7  ;;  %s2302_s2 = sld [smem:[#allocation22_spill]] }
 0x8b1   : > { %s1395_s29 = sshll.u32 %s618_s24, 4  ;;  %s2303_s19 = sand.u32 1, %s1853_s26   ;;  %s1396_s29 = int_to_ptr.vmem [resolvable:$true] %s1395_s29 }
 0x8b2   : > { %s1382_s27 = scalar_lea.sflag [#allocation7], %s2303_s19  ;;  %s1777_s30 = scalar_lea.vmem %s1396_s29, 128 }
 0x8b3   : > { %p1778_p7 = scmp.ne.s32.totalorder %s1396_s29, %s1777_s30  ;;  %s1892_s15 = smov [#allocation6]  }
 0x8b4   : > { %s1781_s13 = sshll.u32 %s1892_s15, 4  ;;  %s1782_s13 = int_to_ptr.vmem [resolvable:$false] %s1781_s13 }
 0x8b5   : > { %p1779_p8 = pnand %p1778_p7, %p2042_p10  ;;  %s1783_s16 = scalar_lea.vmem %s1782_s13, 256 }
 0x8b6   : > { %s1393_s12 = scalar_lea.hbm %s2302_s2, %s1554_s18  ;;  %p1784_p11 = scmp.lt.s32.totalorder %s1396_s29, %s1782_s13 }
 0x8b7   : > { %p1780_p9 = pneg %p1779_p8  ;;  %p1785_p13 = scmp.lt.s32.totalorder %s1783_s16, %s1777_s30 }
 0x8b9   : > { %p1786_p0 = por %p1785_p13, %p1784_p11 }
 0x8bb   : > { %p1787_p1 = pnand %p1786_p0, %p1780_p9 }
 0x8bd   : > { %1790 = shalt.err (!%p1787_p1)
}
 0x8be   : > { %s1791_s14 = scalar_lea.hbm %s1393_s12, 128  ;;  %s1795_s21 = scalar_lea.hbm %s2302_s2, 256 }
 0x8bf   : > { %p1792_p2 = scmp.ne.s32.totalorder %s1393_s12, %s1791_s14  ;;  %p1796_p5 = scmp.lt.s32.totalorder %s1393_s12, %s2302_s2 }
 0x8c0   : > { %p1797_p6 = scmp.lt.s32.totalorder %s1795_s21, %s1791_s14 }
 0x8c1   : > { %p1793_p3 = pnand %p1792_p2, %p2042_p10 }
 0x8c2   : > { %p1798_p7 = por %p1797_p6, %p1796_p5 }
 0x8c3   : > { %p1794_p4 = pneg %p1793_p3 }
 0x8c5   : > { %p1799_p8 = pnand %p1798_p7, %p1794_p4 }
 0x8c7   : > { %1802 = shalt.err (!%p1799_p8)
}
 0x8c8   : > { %1675 = dma.vmem_to_hbm [thread:$0]  (%p2042_p10), %s1396_s29, 128, %s1393_s12, %s1382_s27  }
 0x8c9 PF: > { %p1681_p9 = scmp.ge.s32.totalorder %s1885_s17, 2  ;;  %s1407_s22 = sand.u32 1, %s1849_s25  }
 0x8ca   : > { %s1408_s28 = scalar_lea.sflag [#allocation7], %s1407_s22 }
 0x8cb   : > { %p1678_p11 = pnand %p1681_p9, %p2049_p12 }
 0x8cd   : > { %p1679_p13 = pneg %p1678_p11 }
 0x8cf   : > { %1844 = dma.done.wait (%p1679_p13), %s1408_s28, 128  }
 0x8d0   : > { %1846 = vsyncadd (%p1679_p13), %s1408_s28, 4294967168  ;;  %s26_s17 = sadd.s32 1, %s1885_s17   ;;  %s2304_s19 = sld [smem:[#allocation9_spill]] }
 0x8d1   : > { %p23_p0 = scmp.ge.s32.totalorder %s26_s17, 10   ;;  %s2305_s27 = sld [smem:[#allocation16_spill]] }
 0x8d2   : > { %s2306_s28 = sld [smem:[#allocation10_spill]]  ;;  %s2312_s25 = smov %s1853_s26 }
 0x8d3   : > { %s2307_s29 = sld [smem:[#allocation15_spill]]  ;;  %25 = sbr.rel (!%p23_p0) target bundleno = 13 (0xd), region = 210 }
 0x8d4   : > { %s2308_s30 = sld [smem:[#allocation11_spill]] }
 0x8d5   : > { %s2309_s14 = sld [smem:[#allocation12_spill]] }
 0x8d6   : > { %s2310_s15 = sld [smem:[#allocation13_spill]]  ;;  %s2313_s26 = smov %s2304_s19 }
 0x8d7   : > { %s2311_s16 = sld [smem:[#allocation14_spill]] }
 0x8d8   :  { %1413 = vsyncpa [#allocation7], 1 }
 0x8d9   :  { %1415 = vsyncpa [#allocation7 + $0x1], 1 }

</bundles_post_ra>
